<compile_context>
chip_gen: v6e
topology: v6e:2x2x1
jax: 0.10.0
libtpu: 0.0.40
codegen_flags: <defaults>
</compile_context>

<pallas_src>
import functools
import numpy as np
import jax
import jax.numpy as jnp
from jax.experimental import pallas as pl
from jax.experimental.pallas import tpu as pltpu

LN_EPS = 1e-5


def _layer_norm_rows(x, gamma, beta):
    mu = jnp.mean(x, axis=-1, keepdims=True)
    var = jnp.mean(jnp.square(x - mu), axis=-1, keepdims=True)
    return (x - mu) * jax.lax.rsqrt(var + LN_EPS) * gamma + beta


def _encoder_stack_kernel(src_ref, in_w_ref, out_w_ref, w1_ref, w2_ref, vec_ref,
                          o_ref, acc_ref, *, nhead, dim_ff, ff_chunk,
                          compute_dtype, approx_recip):
    layer = pl.program_id(1)

    # Load activations once per batch block; they stay resident in the output
    # VMEM block across the sequential ("arbitrary") layer axis.
    @pl.when(layer == 0)
    def _():
        o_ref[...] = src_ref[...].astype(o_ref.dtype)

    bt, seq, d_model = o_ref.shape
    head_dim = d_model // nhead
    rows_n = bt * seq
    cdt = compute_dtype

    # Packed per-layer vectors: [in_b, out_b, b1, b2, g1, beta1, g2, beta2].
    vecs = vec_ref[0]                                  # (8, W) float32
    in_b = vecs[0:1, :3 * d_model]
    out_b = vecs[1:2, :d_model]
    g1, beta1 = vecs[4:5, :d_model], vecs[5:6, :d_model]
    g2, beta2 = vecs[6:7, :d_model], vecs[7:8, :d_model]

    x = o_ref[...].astype(jnp.float32)                 # (bt, S, D)
    rows = x.reshape(rows_n, d_model)                  # cheap major-dim collapse

    # ---- fused QKV projection: one full-depth matmul, weights pre-transposed;
    # 1/sqrt(head_dim) already folded into the Q columns on the host.
    qkv = jnp.dot(rows.astype(cdt), in_w_ref[0],
                  preferred_element_type=jnp.float32) + in_b        # (rows, 3D)
    q = qkv[:, :d_model].astype(cdt).reshape(bt, seq, d_model)
    k = qkv[:, d_model:2 * d_model].astype(cdt).reshape(bt, seq, d_model)
    v = qkv[:, 2 * d_model:].astype(cdt).reshape(bt, seq, d_model)

    # ---- multi-head self-attention.  Each head's context is written straight
    # into the VMEM scratch slab (no lane-axis concat; only one (bt, S, S)
    # score tensor's data is needed at a time).
    # TODO(synk): flash-style query-block tiling for very long sequences.
    for h in range(nhead):
        lo = h * head_dim
        qh = q[:, :, lo:lo + head_dim]
        kh = k[:, :, lo:lo + head_dim]
        vh = v[:, :, lo:lo + head_dim]
        s = jnp.einsum("bqe,bke->bqk", qh, kh,
                       preferred_element_type=jnp.float32)          # (bt, S, S)
        s = s - jnp.max(s, axis=-1, keepdims=True)
        p = jnp.exp(s)
        p = p * pl.reciprocal(jnp.sum(p, axis=-1, keepdims=True),
                              approx=approx_recip)
        ctxh = jnp.einsum("bqk,bke->bqe", p.astype(cdt), vh,
                          preferred_element_type=jnp.float32)       # (bt, S, hd)
        acc_ref[:, lo:lo + head_dim] = ctxh.reshape(rows_n, head_dim)

    # single full-depth (rows, D) @ (D, D) output projection
    ctx = acc_ref[...]
    attn = jnp.dot(ctx.astype(cdt), out_w_ref[0],
                   preferred_element_type=jnp.float32) + out_b

    # ---- residual + LayerNorm 1 (dropout == identity), float32 VPU math
    x1 = _layer_norm_rows(rows + attn, g1, beta1)
    x1c = x1.astype(cdt)

    # ---- feedforward, chunked over dim_feedforward: live intermediate bounded
    # to (rows, ff_chunk); accumulate into the (now free) scratch slab.
    acc_ref[...] = jnp.broadcast_to(vecs[3:4, :d_model], (rows_n, d_model))  # b2
    for c in range(dim_ff // ff_chunk):
        lo = c * ff_chunk
        h1 = jnp.dot(x1c, w1_ref[0, :, lo:lo + ff_chunk],
                     preferred_element_type=jnp.float32) + vecs[2:3, lo:lo + ff_chunk]
        h1 = jnp.maximum(h1, 0.0)
        acc_ref[...] += jnp.dot(h1.astype(cdt), w2_ref[0, lo:lo + ff_chunk, :],
                                preferred_element_type=jnp.float32)
    ff = acc_ref[...]

    # ---- residual + LayerNorm 2
    y = _layer_norm_rows(x1 + ff, g2, beta2)
    o_ref[...] = y.reshape(bt, seq, d_model).astype(o_ref.dtype)


# ----------------------------- host-side helpers -----------------------------
def _device_kind():
    try:
        return jax.devices()[0].device_kind.lower()
    except Exception:
        return ""


def _pick_ff_chunk(dim_ff, target=512):
    if dim_ff <= target:
        return dim_ff
    for c in range(target, 0, -1):
        if dim_ff % c == 0:
            return c
    return dim_ff


def _working_set_bytes(bt, seq, d_model, dim_ff, ff_chunk, weight_bytes_per_layer):
    """Rough per-block VMEM working-set estimate (weights double-buffered +
    activation blocks + major in-kernel intermediates)."""
    rows = bt * seq
    act = rows * d_model * 4
    qkv = rows * 3 * d_model * (4 + 2)          # f32 result + bf16 q/k/v copies
    scores = 2 * bt * seq * seq * 4             # one head's s + p
    ffn = rows * ff_chunk * (4 + 2)             # h1 f32 + bf16 copy
    misc = 6 * act                              # rows / x1 / attn / ff / y temps
    return (2 * weight_bytes_per_layer          # double-buffered weight stream
            + 2 * act                           # src input block (double-buffered)
            + 2 * act                           # resident output block
            + act                               # scratch slab
            + qkv + scores + ffn + misc)


def _pack_layer_params(layer_params, nhead, compute_dtype):
    """Stack per-layer params over a layer axis, pre-transpose matmul weights to
    contraction-major layout, fold the attention scale into the Q in-projection,
    cast MXU operands to the compute dtype, and pack the 8 small vectors into a
    single (L, 8, W) array (one DMA instead of eight)."""
    L = len(layer_params)
    d_model = layer_params[0]["out_w"].shape[0]
    dim_ff = layer_params[0]["w1"].shape[0]
    head_dim = d_model // nhead
    scale = 1.0 / float(np.sqrt(head_dim))
    q_scale = jnp.concatenate([jnp.full((d_model,), scale, jnp.float32),
                               jnp.ones((2 * d_model,), jnp.float32)])

    def stack(name):
        return jnp.stack([p[name] for p in layer_params], axis=0)

    in_w = jnp.transpose(stack("in_w"), (0, 2, 1)) * q_scale[None, None, :]  # (L, D, 3D)
    out_w = jnp.transpose(stack("out_w"), (0, 2, 1))                         # (L, D, D)
    w1 = jnp.transpose(stack("w1"), (0, 2, 1))                               # (L, D, FF)
    w2 = jnp.transpose(stack("w2"), (0, 2, 1))                               # (L, FF, D)

    W = max(3 * d_model, dim_ff, d_model)

    def pad_row(v):                                   # (L, 1, n) -> (L, W)
        v = v.reshape(L, -1)
        return jnp.pad(v, ((0, 0), (0, W - v.shape[1])))

    in_b = stack("in_b") * q_scale[None, None, :]
    vec_rows = [pad_row(in_b), pad_row(stack("out_b")), pad_row(stack("b1")),
                pad_row(stack("b2")), pad_row(stack("g1")), pad_row(stack("beta1")),
                pad_row(stack("g2")), pad_row(stack("beta2"))]
    vecs = jnp.stack(vec_rows, axis=1).astype(jnp.float32)                   # (L, 8, W)

    return [in_w.astype(compute_dtype), out_w.astype(compute_dtype),
            w1.astype(compute_dtype), w2.astype(compute_dtype), vecs]


def transformer_encoder(src_sbd, layer_params, nhead, *, batch_tile=None,
                        ff_chunk=None, compute_dtype=jnp.bfloat16,
                        approx_softmax_recip=False):
    """src_sbd: (S, B, D) float32 — PyTorch (seq, batch, d_model) convention.
    For production sizes use d_model / head_dim multiples of 128 and seq a
    multiple of 8 (lane-dense stores, full MXU contraction depth)."""
    seq, batch, d_model = src_sbd.shape
    num_layers = len(layer_params)
    dim_ff = layer_params[0]["w1"].shape[0]
    assert d_model % nhead == 0

    x = jnp.transpose(src_sbd, (1, 0, 2))              # -> (B, S, D)

    weights = _pack_layer_params(layer_params, nhead, compute_dtype)
    weight_bytes_per_layer = sum(int(np.prod(w.shape[1:])) * w.dtype.itemsize
                                 for w in weights)

    if ff_chunk is None:
        ff_chunk = _pick_ff_chunk(dim_ff)
    assert dim_ff % ff_chunk == 0

    kind = _device_kind()
    is_v7x = "v7" in kind
    vmem_cap = (56 << 20) if is_v7x else (100 << 20)   # per-core budget

    if batch_tile is None:
        # Single-TC chips (v5e/v6e): one batch block (weights streamed once per
        # layer).  v7x: two blocks, one per TensorCore.  Shrink only if the
        # per-block working set overflows the per-core VMEM budget.
        target_blocks = 2 if is_v7x else 1
        cands = [d for d in range(1, batch + 1)
                 if batch % d == 0 and batch // d >= target_blocks]
        bt = max(cands) if cands else batch
        while bt > 1 and _working_set_bytes(bt, seq, d_model, dim_ff, ff_chunk,
                                            weight_bytes_per_layer) > int(0.9 * vmem_cap):
            bt = max(d for d in range(1, bt) if batch % d == 0)
        batch_tile = bt
    assert batch % batch_tile == 0
    num_batch_blocks = batch // batch_tile

    ws = _working_set_bytes(batch_tile, seq, d_model, dim_ff, ff_chunk,
                            weight_bytes_per_layer)
    vmem_limit = int(min(max(ws + (8 << 20), 32 << 20), vmem_cap))

    act_spec = pl.BlockSpec((batch_tile, seq, d_model), lambda b, l: (b, 0, 0))
    out_spec = pl.BlockSpec((batch_tile, seq, d_model), lambda b, l: (b, 0, 0))
    weight_specs = [pl.BlockSpec((1,) + tuple(w.shape[1:]), lambda b, l: (l, 0, 0))
                    for w in weights]

    kernel = functools.partial(_encoder_stack_kernel, nhead=nhead, dim_ff=dim_ff,
                               ff_chunk=ff_chunk, compute_dtype=compute_dtype,
                               approx_recip=approx_softmax_recip)
    out = pl.pallas_call(
        kernel,
        out_shape=jax.ShapeDtypeStruct((batch, seq, d_model), jnp.float32),
        grid_spec=pltpu.PrefetchScalarGridSpec(
            num_scalar_prefetch=0,
            grid=(num_batch_blocks, num_layers),
            in_specs=[act_spec] + weight_specs,
            out_specs=out_spec,
            scratch_shapes=[pltpu.VMEM((batch_tile * seq, d_model), jnp.float32)],
        ),
        compiler_params=pltpu.CompilerParams(
            dimension_semantics=("parallel", "arbitrary"),
            vmem_limit_bytes=vmem_limit),
    )(x, *weights)
    return jnp.transpose(out, (1, 0, 2))               # -> (S, B, D)


# ---------------------------- pure-JAX reference ----------------------------
def _ref_layer(x, p, nhead):
    B, S, D = x.shape
    hd = D // nhead
    scale = 1.0 / float(np.sqrt(hd))
    qkv = jnp.einsum("bsd,ed->bse", x, p["in_w"]) + p["in_b"][0]
    q, k, v = qkv[..., :D], qkv[..., D:2 * D], qkv[..., 2 * D:]
    q = q.reshape(B, S, nhead, hd) * scale
    k = k.reshape(B, S, nhead, hd)
    v = v.reshape(B, S, nhead, hd)
    sc = jnp.einsum("bshk,bthk->bhst", q, k)
    w = jax.nn.softmax(sc, axis=-1)
    o = jnp.einsum("bhst,bthk->bshk", w, v).reshape(B, S, D)
    o = jnp.einsum("bsd,ed->bse", o, p["out_w"]) + p["out_b"][0]
    x = x + o
    mu = jnp.mean(x, -1, keepdims=True)
    var = jnp.mean((x - mu) ** 2, -1, keepdims=True)
    x = (x - mu) / jnp.sqrt(var + LN_EPS) * p["g1"][0] + p["beta1"][0]
    h = jax.nn.relu(jnp.einsum("bsd,fd->bsf", x, p["w1"]) + p["b1"][0])
    ff = jnp.einsum("bsf,df->bsd", h, p["w2"]) + p["b2"][0]
    x = x + ff
    mu = jnp.mean(x, -1, keepdims=True)
    var = jnp.mean((x - mu) ** 2, -1, keepdims=True)
    x = (x - mu) / jnp.sqrt(var + LN_EPS) * p["g2"][0] + p["beta2"][0]
    return x


def _ref_encoder(src_sbd, layer_params, nhead):
    x = jnp.transpose(src_sbd, (1, 0, 2))
    for p in layer_params:
        x = _ref_layer(x, p, nhead)
    return jnp.transpose(x, (1, 0, 2))


# ---------------------------- parameter init ---------------------------------
def init_layer_params(key, d_model, dim_ff):
    ks = jax.random.split(key, 6)
    s = 0.05
    return {
        "in_w": jax.random.normal(ks[0], (3 * d_model, d_model), jnp.float32) * s,
        "in_b": jax.random.normal(ks[1], (1, 3 * d_model), jnp.float32) * s,
        "out_w": jax.random.normal(ks[2], (d_model, d_model), jnp.float32) * s,
        "out_b": jax.random.normal(ks[3], (1, d_model), jnp.float32) * s,
        "w1": jax.random.normal(ks[4], (dim_ff, d_model), jnp.float32) * s,
        "b1": jnp.zeros((1, dim_ff), jnp.float32),
        "w2": jax.random.normal(ks[5], (d_model, dim_ff), jnp.float32) * s,
        "b2": jnp.zeros((1, d_model), jnp.float32),
        "g1": jnp.ones((1, d_model), jnp.float32),
        "beta1": jnp.zeros((1, d_model), jnp.float32),
        "g2": jnp.ones((1, d_model), jnp.float32),
        "beta2": jnp.zeros((1, d_model), jnp.float32),
    }


if __name__ == "__main__":
    num_layers = 2
    d_model = 32
    nhead = 4
    dim_feedforward = 64
    seq, batch = 8, 4

    root = jax.random.PRNGKey(0)
    kx, *lkeys = jax.random.split(root, num_layers + 1)
    src = jax.random.normal(kx, (seq, batch, d_model), jnp.float32)   # (S, B, D)
    params = [init_layer_params(k, d_model, dim_feedforward) for k in lkeys]

    out = jax.block_until_ready(transformer_encoder(src, params, nhead))
    ref = jax.block_until_ready(_ref_encoder(src, params, nhead))
    assert out.shape == (seq, batch, d_model)
    # bf16 MXU operands vs the f32 reference.
    np.testing.assert_allclose(np.asarray(out), np.asarray(ref), rtol=2e-2, atol=2e-2)

    print("KERNEL_OK")
</pallas_src>

<mosaic_0001>
module attributes {stable_mosaic.version = 11 : i64} {
  func.func @_encoder_stack_kernel(%arg0: i32, %arg1: i32, %arg2: memref<4x8x32xf32, #tpu.memory_space<vmem>>, %arg3: memref<1x32x96xbf16, #tpu.memory_space<vmem>>, %arg4: memref<1x32x32xbf16, #tpu.memory_space<vmem>>, %arg5: memref<1x32x64xbf16, #tpu.memory_space<vmem>>, %arg6: memref<1x64x32xbf16, #tpu.memory_space<vmem>>, %arg7: memref<1x8x96xf32, #tpu.memory_space<vmem>>, %arg8: memref<4x8x32xf32, #tpu.memory_space<vmem>>, %arg9: memref<32x32xf32, #tpu.memory_space<vmem>>) attributes {dimension_semantics = [#tpu.dimension_semantics<parallel>, #tpu.dimension_semantics<arbitrary>], iteration_bounds = array<i64: 1, 2>, scalar_prefetch = 0 : i64, scratch_operands = 1 : i64, tpu.core_type = #tpu.core_type<tc>, window_params = [{transform_indices = @transform_0, window_bounds = array<i64: 4, 8, 32>}, {transform_indices = @transform_1, window_bounds = array<i64: 1, 32, 96>}, {transform_indices = @transform_2, window_bounds = array<i64: 1, 32, 32>}, {transform_indices = @transform_3, window_bounds = array<i64: 1, 32, 64>}, {transform_indices = @transform_4, window_bounds = array<i64: 1, 64, 32>}, {transform_indices = @transform_5, window_bounds = array<i64: 1, 8, 96>}, {transform_indices = @transform_6, window_bounds = array<i64: 4, 8, 32>}]} {
    %c0_i32 = arith.constant 0 : i32
    %0 = arith.cmpi eq, %arg1, %c0_i32 : i32
    %1 = arith.extui %0 : i1 to i32
    %c0_i32_0 = arith.constant 0 : i32
    %2 = arith.cmpi ne, %1, %c0_i32_0 : i32
    scf.if %2 {
      %c0_66 = arith.constant 0 : index
      %c0_67 = arith.constant 0 : index
      %c0_68 = arith.constant 0 : index
      %176 = vector.load %arg2[%c0_66, %c0_67, %c0_68] : memref<4x8x32xf32, #tpu.memory_space<vmem>>, vector<4x8x32xf32>
      %c0_69 = arith.constant 0 : index
      %c0_70 = arith.constant 0 : index
      %c0_71 = arith.constant 0 : index
      %177 = vector.load %arg8[%c0_69, %c0_70, %c0_71] : memref<4x8x32xf32, #tpu.memory_space<vmem>>, vector<4x8x32xf32>
      tpu.vector_store %arg8[%c0_69, %c0_70, %c0_71], %176 {strides = array<i32>} : memref<4x8x32xf32, #tpu.memory_space<vmem>>, vector<4x8x32xf32>,
    } else {
    }
    %c0 = arith.constant 0 : index
    %c0_1 = arith.constant 0 : index
    %c0_2 = arith.constant 0 : index
    %3 = vector.load %arg7[%c0, %c0_1, %c0_2] : memref<1x8x96xf32, #tpu.memory_space<vmem>>, vector<1x8x96xf32>
    %4 = vector.shape_cast %3 : vector<1x8x96xf32> to vector<8x96xf32>
    %5 = vector.extract_strided_slice %4 {offsets = [0, 0], sizes = [1, 96], strides = [1, 1]} : vector<8x96xf32> to vector<1x96xf32>
    %6 = vector.extract_strided_slice %4 {offsets = [1, 0], sizes = [1, 32], strides = [1, 1]} : vector<8x96xf32> to vector<1x32xf32>
    %7 = vector.extract_strided_slice %4 {offsets = [4, 0], sizes = [1, 32], strides = [1, 1]} : vector<8x96xf32> to vector<1x32xf32>
    %8 = vector.extract_strided_slice %4 {offsets = [5, 0], sizes = [1, 32], strides = [1, 1]} : vector<8x96xf32> to vector<1x32xf32>
    %9 = vector.extract_strided_slice %4 {offsets = [6, 0], sizes = [1, 32], strides = [1, 1]} : vector<8x96xf32> to vector<1x32xf32>
    %10 = vector.extract_strided_slice %4 {offsets = [7, 0], sizes = [1, 32], strides = [1, 1]} : vector<8x96xf32> to vector<1x32xf32>
    %c0_3 = arith.constant 0 : index
    %c0_4 = arith.constant 0 : index
    %c0_5 = arith.constant 0 : index
    %11 = vector.load %arg8[%c0_3, %c0_4, %c0_5] : memref<4x8x32xf32, #tpu.memory_space<vmem>>, vector<4x8x32xf32>
    %12 = vector.shape_cast %11 : vector<4x8x32xf32> to vector<32x32xf32>
    %13 = arith.truncf %12 : vector<32x32xf32> to vector<32x32xbf16>
    %c0_6 = arith.constant 0 : index
    %c0_7 = arith.constant 0 : index
    %c0_8 = arith.constant 0 : index
    %14 = vector.load %arg3[%c0_6, %c0_7, %c0_8] : memref<1x32x96xbf16, #tpu.memory_space<vmem>>, vector<1x32x96xbf16>
    %15 = vector.shape_cast %14 : vector<1x32x96xbf16> to vector<32x96xbf16>
    %cst = arith.constant dense<0.000000e+00> : vector<32x96xf32>
    %16 = tpu.matmul %13, %15, %cst {dimension_numbers = #tpu.dot_dimension_numbers<[1], [0], [0], [1], [0, 0, 1, 1], [], []>} : vector<32x32xbf16>, vector<32x96xbf16>, vector<32x96xf32> -> vector<32x96xf32>
    %17 = vector.broadcast %5 : vector<1x96xf32> to vector<32x96xf32>
    %18 = arith.addf %16, %17 : vector<32x96xf32>
    %19 = vector.extract_strided_slice %18 {offsets = [0, 0], sizes = [32, 32], strides = [1, 1]} : vector<32x96xf32> to vector<32x32xf32>
    %20 = arith.truncf %19 : vector<32x32xf32> to vector<32x32xbf16>
    %21 = vector.shape_cast %20 : vector<32x32xbf16> to vector<4x8x32xbf16>
    %22 = vector.extract_strided_slice %18 {offsets = [0, 32], sizes = [32, 32], strides = [1, 1]} : vector<32x96xf32> to vector<32x32xf32>
    %23 = arith.truncf %22 : vector<32x32xf32> to vector<32x32xbf16>
    %24 = vector.shape_cast %23 : vector<32x32xbf16> to vector<4x8x32xbf16>
    %25 = vector.extract_strided_slice %18 {offsets = [0, 64], sizes = [32, 32], strides = [1, 1]} : vector<32x96xf32> to vector<32x32xf32>
    %26 = arith.truncf %25 : vector<32x32xf32> to vector<32x32xbf16>
    %27 = vector.shape_cast %26 : vector<32x32xbf16> to vector<4x8x32xbf16>
    %28 = vector.extract_strided_slice %21 {offsets = [0, 0, 0], sizes = [4, 8, 8], strides = [1, 1, 1]} : vector<4x8x32xbf16> to vector<4x8x8xbf16>
    %29 = vector.extract_strided_slice %24 {offsets = [0, 0, 0], sizes = [4, 8, 8], strides = [1, 1, 1]} : vector<4x8x32xbf16> to vector<4x8x8xbf16>
    %30 = vector.extract_strided_slice %27 {offsets = [0, 0, 0], sizes = [4, 8, 8], strides = [1, 1, 1]} : vector<4x8x32xbf16> to vector<4x8x8xbf16>
    "tpu.trace_start"() <{level = 10 : i32, message = "bqe,bke->bqk"}> : () -> ()
    %cst_9 = arith.constant dense<0.000000e+00> : vector<4x8x8xf32>
    %31 = tpu.matmul %28, %29, %cst_9 {dimension_numbers = #tpu.dot_dimension_numbers<[2], [2], [1], [1], [0, 0, 0, 1, 1, 1], [0], [0]>} : vector<4x8x8xbf16>, vector<4x8x8xbf16>, vector<4x8x8xf32> -> vector<4x8x8xf32>
    "tpu.trace_stop"() : () -> ()
    %cst_10 = arith.constant dense<0xFF800000> : vector<4x8xf32>
    %32 = vector.multi_reduction <maximumf>, %31, %cst_10 [2] : vector<4x8x8xf32> to vector<4x8xf32>
    %33 = vector.shape_cast %32 : vector<4x8xf32> to vector<4x8x1xf32>
    %34 = vector.broadcast %33 : vector<4x8x1xf32> to vector<4x8x8xf32>
    %35 = arith.subf %31, %34 : vector<4x8x8xf32>
    %36 = math.exp %35 : vector<4x8x8xf32>
    %cst_11 = arith.constant dense<0.000000e+00> : vector<4x8xf32>
    %37 = vector.multi_reduction <add>, %36, %cst_11 [2] : vector<4x8x8xf32> to vector<4x8xf32>
    %38 = vector.shape_cast %37 : vector<4x8xf32> to vector<4x8x1xf32>
    %39 = tpu.reciprocal %38 : vector<4x8x1xf32> -> vector<4x8x1xf32>
    %40 = vector.broadcast %39 : vector<4x8x1xf32> to vector<4x8x8xf32>
    %41 = arith.mulf %36, %40 : vector<4x8x8xf32>
    %42 = arith.truncf %41 : vector<4x8x8xf32> to vector<4x8x8xbf16>
    "tpu.trace_start"() <{level = 10 : i32, message = "bqk,bke->bqe"}> : () -> ()
    %cst_12 = arith.constant dense<0.000000e+00> : vector<4x8x8xf32>
    %43 = tpu.matmul %42, %30, %cst_12 {dimension_numbers = #tpu.dot_dimension_numbers<[2], [1], [1], [2], [0, 0, 0, 1, 1, 2], [0], [0]>} : vector<4x8x8xbf16>, vector<4x8x8xbf16>, vector<4x8x8xf32> -> vector<4x8x8xf32>
    "tpu.trace_stop"() : () -> ()
    %44 = vector.shape_cast %43 : vector<4x8x8xf32> to vector<32x8xf32>
    %c0_13 = arith.constant 0 : index
    %c0_14 = arith.constant 0 : index
    %45 = vector.load %arg9[%c0_13, %c0_14] : memref<32x32xf32, #tpu.memory_space<vmem>>, vector<32x8xf32>
    tpu.vector_store %arg9[%c0_13, %c0_14], %44 {strides = array<i32>} : memref<32x32xf32, #tpu.memory_space<vmem>>, vector<32x8xf32>,
    %46 = vector.extract_strided_slice %21 {offsets = [0, 0, 8], sizes = [4, 8, 8], strides = [1, 1, 1]} : vector<4x8x32xbf16> to vector<4x8x8xbf16>
    %47 = vector.extract_strided_slice %24 {offsets = [0, 0, 8], sizes = [4, 8, 8], strides = [1, 1, 1]} : vector<4x8x32xbf16> to vector<4x8x8xbf16>
    %48 = vector.extract_strided_slice %27 {offsets = [0, 0, 8], sizes = [4, 8, 8], strides = [1, 1, 1]} : vector<4x8x32xbf16> to vector<4x8x8xbf16>
    "tpu.trace_start"() <{level = 10 : i32, message = "bqe,bke->bqk"}> : () -> ()
    %cst_15 = arith.constant dense<0.000000e+00> : vector<4x8x8xf32>
    %49 = tpu.matmul %46, %47, %cst_15 {dimension_numbers = #tpu.dot_dimension_numbers<[2], [2], [1], [1], [0, 0, 0, 1, 1, 1], [0], [0]>} : vector<4x8x8xbf16>, vector<4x8x8xbf16>, vector<4x8x8xf32> -> vector<4x8x8xf32>
    "tpu.trace_stop"() : () -> ()
    %cst_16 = arith.constant dense<0xFF800000> : vector<4x8xf32>
    %50 = vector.multi_reduction <maximumf>, %49, %cst_16 [2] : vector<4x8x8xf32> to vector<4x8xf32>
    %51 = vector.shape_cast %50 : vector<4x8xf32> to vector<4x8x1xf32>
    %52 = vector.broadcast %51 : vector<4x8x1xf32> to vector<4x8x8xf32>
    %53 = arith.subf %49, %52 : vector<4x8x8xf32>
    %54 = math.exp %53 : vector<4x8x8xf32>
    %cst_17 = arith.constant dense<0.000000e+00> : vector<4x8xf32>
    %55 = vector.multi_reduction <add>, %54, %cst_17 [2] : vector<4x8x8xf32> to vector<4x8xf32>
    %56 = vector.shape_cast %55 : vector<4x8xf32> to vector<4x8x1xf32>
    %57 = tpu.reciprocal %56 : vector<4x8x1xf32> -> vector<4x8x1xf32>
    %58 = vector.broadcast %57 : vector<4x8x1xf32> to vector<4x8x8xf32>
    %59 = arith.mulf %54, %58 : vector<4x8x8xf32>
    %60 = arith.truncf %59 : vector<4x8x8xf32> to vector<4x8x8xbf16>
    "tpu.trace_start"() <{level = 10 : i32, message = "bqk,bke->bqe"}> : () -> ()
    %cst_18 = arith.constant dense<0.000000e+00> : vector<4x8x8xf32>
    %61 = tpu.matmul %60, %48, %cst_18 {dimension_numbers = #tpu.dot_dimension_numbers<[2], [1], [1], [2], [0, 0, 0, 1, 1, 2], [0], [0]>} : vector<4x8x8xbf16>, vector<4x8x8xbf16>, vector<4x8x8xf32> -> vector<4x8x8xf32>
    "tpu.trace_stop"() : () -> ()
    %62 = vector.shape_cast %61 : vector<4x8x8xf32> to vector<32x8xf32>
    %c0_19 = arith.constant 0 : index
    %c8 = arith.constant 8 : index
    %63 = vector.load %arg9[%c0_19, %c8] : memref<32x32xf32, #tpu.memory_space<vmem>>, vector<32x8xf32>
    tpu.vector_store %arg9[%c0_19, %c8], %62 {strides = array<i32>} : memref<32x32xf32, #tpu.memory_space<vmem>>, vector<32x8xf32>,
    %64 = vector.extract_strided_slice %21 {offsets = [0, 0, 16], sizes = [4, 8, 8], strides = [1, 1, 1]} : vector<4x8x32xbf16> to vector<4x8x8xbf16>
    %65 = vector.extract_strided_slice %24 {offsets = [0, 0, 16], sizes = [4, 8, 8], strides = [1, 1, 1]} : vector<4x8x32xbf16> to vector<4x8x8xbf16>
    %66 = vector.extract_strided_slice %27 {offsets = [0, 0, 16], sizes = [4, 8, 8], strides = [1, 1, 1]} : vector<4x8x32xbf16> to vector<4x8x8xbf16>
    "tpu.trace_start"() <{level = 10 : i32, message = "bqe,bke->bqk"}> : () -> ()
    %cst_20 = arith.constant dense<0.000000e+00> : vector<4x8x8xf32>
    %67 = tpu.matmul %64, %65, %cst_20 {dimension_numbers = #tpu.dot_dimension_numbers<[2], [2], [1], [1], [0, 0, 0, 1, 1, 1], [0], [0]>} : vector<4x8x8xbf16>, vector<4x8x8xbf16>, vector<4x8x8xf32> -> vector<4x8x8xf32>
    "tpu.trace_stop"() : () -> ()
    %cst_21 = arith.constant dense<0xFF800000> : vector<4x8xf32>
    %68 = vector.multi_reduction <maximumf>, %67, %cst_21 [2] : vector<4x8x8xf32> to vector<4x8xf32>
    %69 = vector.shape_cast %68 : vector<4x8xf32> to vector<4x8x1xf32>
    %70 = vector.broadcast %69 : vector<4x8x1xf32> to vector<4x8x8xf32>
    %71 = arith.subf %67, %70 : vector<4x8x8xf32>
    %72 = math.exp %71 : vector<4x8x8xf32>
    %cst_22 = arith.constant dense<0.000000e+00> : vector<4x8xf32>
    %73 = vector.multi_reduction <add>, %72, %cst_22 [2] : vector<4x8x8xf32> to vector<4x8xf32>
    %74 = vector.shape_cast %73 : vector<4x8xf32> to vector<4x8x1xf32>
    %75 = tpu.reciprocal %74 : vector<4x8x1xf32> -> vector<4x8x1xf32>
    %76 = vector.broadcast %75 : vector<4x8x1xf32> to vector<4x8x8xf32>
    %77 = arith.mulf %72, %76 : vector<4x8x8xf32>
    %78 = arith.truncf %77 : vector<4x8x8xf32> to vector<4x8x8xbf16>
    "tpu.trace_start"() <{level = 10 : i32, message = "bqk,bke->bqe"}> : () -> ()
    %cst_23 = arith.constant dense<0.000000e+00> : vector<4x8x8xf32>
    %79 = tpu.matmul %78, %66, %cst_23 {dimension_numbers = #tpu.dot_dimension_numbers<[2], [1], [1], [2], [0, 0, 0, 1, 1, 2], [0], [0]>} : vector<4x8x8xbf16>, vector<4x8x8xbf16>, vector<4x8x8xf32> -> vector<4x8x8xf32>
    "tpu.trace_stop"() : () -> ()
    %80 = vector.shape_cast %79 : vector<4x8x8xf32> to vector<32x8xf32>
    %c0_24 = arith.constant 0 : index
    %c16 = arith.constant 16 : index
    %81 = vector.load %arg9[%c0_24, %c16] : memref<32x32xf32, #tpu.memory_space<vmem>>, vector<32x8xf32>
    tpu.vector_store %arg9[%c0_24, %c16], %80 {strides = array<i32>} : memref<32x32xf32, #tpu.memory_space<vmem>>, vector<32x8xf32>,
    %82 = vector.extract_strided_slice %21 {offsets = [0, 0, 24], sizes = [4, 8, 8], strides = [1, 1, 1]} : vector<4x8x32xbf16> to vector<4x8x8xbf16>
    %83 = vector.extract_strided_slice %24 {offsets = [0, 0, 24], sizes = [4, 8, 8], strides = [1, 1, 1]} : vector<4x8x32xbf16> to vector<4x8x8xbf16>
    %84 = vector.extract_strided_slice %27 {offsets = [0, 0, 24], sizes = [4, 8, 8], strides = [1, 1, 1]} : vector<4x8x32xbf16> to vector<4x8x8xbf16>
    "tpu.trace_start"() <{level = 10 : i32, message = "bqe,bke->bqk"}> : () -> ()
    %cst_25 = arith.constant dense<0.000000e+00> : vector<4x8x8xf32>
    %85 = tpu.matmul %82, %83, %cst_25 {dimension_numbers = #tpu.dot_dimension_numbers<[2], [2], [1], [1], [0, 0, 0, 1, 1, 1], [0], [0]>} : vector<4x8x8xbf16>, vector<4x8x8xbf16>, vector<4x8x8xf32> -> vector<4x8x8xf32>
    "tpu.trace_stop"() : () -> ()
    %cst_26 = arith.constant dense<0xFF800000> : vector<4x8xf32>
    %86 = vector.multi_reduction <maximumf>, %85, %cst_26 [2] : vector<4x8x8xf32> to vector<4x8xf32>
    %87 = vector.shape_cast %86 : vector<4x8xf32> to vector<4x8x1xf32>
    %88 = vector.broadcast %87 : vector<4x8x1xf32> to vector<4x8x8xf32>
    %89 = arith.subf %85, %88 : vector<4x8x8xf32>
    %90 = math.exp %89 : vector<4x8x8xf32>
    %cst_27 = arith.constant dense<0.000000e+00> : vector<4x8xf32>
    %91 = vector.multi_reduction <add>, %90, %cst_27 [2] : vector<4x8x8xf32> to vector<4x8xf32>
    %92 = vector.shape_cast %91 : vector<4x8xf32> to vector<4x8x1xf32>
    %93 = tpu.reciprocal %92 : vector<4x8x1xf32> -> vector<4x8x1xf32>
    %94 = vector.broadcast %93 : vector<4x8x1xf32> to vector<4x8x8xf32>
    %95 = arith.mulf %90, %94 : vector<4x8x8xf32>
    %96 = arith.truncf %95 : vector<4x8x8xf32> to vector<4x8x8xbf16>
    "tpu.trace_start"() <{level = 10 : i32, message = "bqk,bke->bqe"}> : () -> ()
    %cst_28 = arith.constant dense<0.000000e+00> : vector<4x8x8xf32>
    %97 = tpu.matmul %96, %84, %cst_28 {dimension_numbers = #tpu.dot_dimension_numbers<[2], [1], [1], [2], [0, 0, 0, 1, 1, 2], [0], [0]>} : vector<4x8x8xbf16>, vector<4x8x8xbf16>, vector<4x8x8xf32> -> vector<4x8x8xf32>
    "tpu.trace_stop"() : () -> ()
    %98 = vector.shape_cast %97 : vector<4x8x8xf32> to vector<32x8xf32>
    %c0_29 = arith.constant 0 : index
    %c24 = arith.constant 24 : index
    %99 = vector.load %arg9[%c0_29, %c24] : memref<32x32xf32, #tpu.memory_space<vmem>>, vector<32x8xf32>
    tpu.vector_store %arg9[%c0_29, %c24], %98 {strides = array<i32>} : memref<32x32xf32, #tpu.memory_space<vmem>>, vector<32x8xf32>,
    %c0_30 = arith.constant 0 : index
    %c0_31 = arith.constant 0 : index
    %100 = vector.load %arg9[%c0_30, %c0_31] : memref<32x32xf32, #tpu.memory_space<vmem>>, vector<32x32xf32>
    %101 = arith.truncf %100 : vector<32x32xf32> to vector<32x32xbf16>
    %c0_32 = arith.constant 0 : index
    %c0_33 = arith.constant 0 : index
    %c0_34 = arith.constant 0 : index
    %102 = vector.load %arg4[%c0_32, %c0_33, %c0_34] : memref<1x32x32xbf16, #tpu.memory_space<vmem>>, vector<1x32x32xbf16>
    %103 = vector.shape_cast %102 : vector<1x32x32xbf16> to vector<32x32xbf16>
    %cst_35 = arith.constant dense<0.000000e+00> : vector<32x32xf32>
    %104 = tpu.matmul %101, %103, %cst_35 {dimension_numbers = #tpu.dot_dimension_numbers<[1], [0], [0], [1], [0, 0, 1, 1], [], []>} : vector<32x32xbf16>, vector<32x32xbf16>, vector<32x32xf32> -> vector<32x32xf32>
    %105 = vector.broadcast %6 : vector<1x32xf32> to vector<32x32xf32>
    %106 = arith.addf %104, %105 : vector<32x32xf32>
    %107 = arith.addf %12, %106 : vector<32x32xf32>
    %cst_36 = arith.constant dense<0.000000e+00> : vector<32xf32>
    %108 = vector.multi_reduction <add>, %107, %cst_36 [1] : vector<32x32xf32> to vector<32xf32>
    %109 = vector.shape_cast %108 : vector<32xf32> to vector<32x1xf32>
    %cst_37 = arith.constant 3.200000e+01 : f32
    %110 = vector.broadcast %cst_37 : f32 to vector<32x1xf32>
    %111 = arith.divf %109, %110 : vector<32x1xf32>
    %112 = vector.broadcast %111 : vector<32x1xf32> to vector<32x32xf32>
    %113 = arith.subf %107, %112 : vector<32x32xf32>
    %114 = arith.mulf %113, %113 : vector<32x32xf32>
    %cst_38 = arith.constant dense<0.000000e+00> : vector<32xf32>
    %115 = vector.multi_reduction <add>, %114, %cst_38 [1] : vector<32x32xf32> to vector<32xf32>
    %116 = vector.shape_cast %115 : vector<32xf32> to vector<32x1xf32>
    %cst_39 = arith.constant 3.200000e+01 : f32
    %117 = vector.broadcast %cst_39 : f32 to vector<32x1xf32>
    %118 = arith.divf %116, %117 : vector<32x1xf32>
    %119 = vector.broadcast %111 : vector<32x1xf32> to vector<32x32xf32>
    %120 = arith.subf %107, %119 : vector<32x32xf32>
    %cst_40 = arith.constant 9.99999974E-6 : f32
    %121 = vector.broadcast %cst_40 : f32 to vector<32x1xf32>
    %122 = arith.addf %118, %121 : vector<32x1xf32>
    %123 = math.rsqrt %122 : vector<32x1xf32>
    %124 = vector.broadcast %123 : vector<32x1xf32> to vector<32x32xf32>
    %125 = arith.mulf %120, %124 : vector<32x32xf32>
    %126 = vector.broadcast %7 : vector<1x32xf32> to vector<32x32xf32>
    %127 = arith.mulf %125, %126 : vector<32x32xf32>
    %128 = vector.broadcast %8 : vector<1x32xf32> to vector<32x32xf32>
    %129 = arith.addf %127, %128 : vector<32x32xf32>
    %130 = arith.truncf %129 : vector<32x32xf32> to vector<32x32xbf16>
    %131 = vector.extract_strided_slice %4 {offsets = [3, 0], sizes = [1, 32], strides = [1, 1]} : vector<8x96xf32> to vector<1x32xf32>
    %132 = vector.shape_cast %131 : vector<1x32xf32> to vector<1x32xf32>
    %133 = vector.broadcast %132 : vector<1x32xf32> to vector<32x32xf32>
    %c0_41 = arith.constant 0 : index
    %c0_42 = arith.constant 0 : index
    %134 = vector.load %arg9[%c0_41, %c0_42] : memref<32x32xf32, #tpu.memory_space<vmem>>, vector<32x32xf32>
    tpu.vector_store %arg9[%c0_41, %c0_42], %133 {strides = array<i32>} : memref<32x32xf32, #tpu.memory_space<vmem>>, vector<32x32xf32>,
    %c0_43 = arith.constant 0 : index
    %c0_44 = arith.constant 0 : index
    %c0_45 = arith.constant 0 : index
    %135 = vector.load %arg5[%c0_43, %c0_44, %c0_45] : memref<1x32x64xbf16, #tpu.memory_space<vmem>>, vector<1x32x64xbf16>
    %136 = vector.shape_cast %135 : vector<1x32x64xbf16> to vector<32x64xbf16>
    %cst_46 = arith.constant dense<0.000000e+00> : vector<32x64xf32>
    %137 = tpu.matmul %130, %136, %cst_46 {dimension_numbers = #tpu.dot_dimension_numbers<[1], [0], [0], [1], [0, 0, 1, 1], [], []>} : vector<32x32xbf16>, vector<32x64xbf16>, vector<32x64xf32> -> vector<32x64xf32>
    %138 = vector.extract_strided_slice %4 {offsets = [2, 0], sizes = [1, 64], strides = [1, 1]} : vector<8x96xf32> to vector<1x64xf32>
    %139 = vector.broadcast %138 : vector<1x64xf32> to vector<32x64xf32>
    %140 = arith.addf %137, %139 : vector<32x64xf32>
    %cst_47 = arith.constant 0.000000e+00 : f32
    %141 = vector.broadcast %cst_47 : f32 to vector<32x64xf32>
    %142 = arith.maximumf %140, %141 : vector<32x64xf32>
    %c0_48 = arith.constant 0 : index
    %c0_49 = arith.constant 0 : index
    %143 = vector.load %arg9[%c0_48, %c0_49] : memref<32x32xf32, #tpu.memory_space<vmem>>, vector<32x32xf32>
    %144 = arith.truncf %142 : vector<32x64xf32> to vector<32x64xbf16>
    %c0_50 = arith.constant 0 : index
    %c0_51 = arith.constant 0 : index
    %c0_52 = arith.constant 0 : index
    %145 = vector.load %arg6[%c0_50, %c0_51, %c0_52] : memref<1x64x32xbf16, #tpu.memory_space<vmem>>, vector<1x64x32xbf16>
    %146 = vector.shape_cast %145 : vector<1x64x32xbf16> to vector<64x32xbf16>
    %cst_53 = arith.constant dense<0.000000e+00> : vector<32x32xf32>
    %147 = tpu.matmul %144, %146, %cst_53 {dimension_numbers = #tpu.dot_dimension_numbers<[1], [0], [0], [1], [0, 0, 1, 1], [], []>} : vector<32x64xbf16>, vector<64x32xbf16>, vector<32x32xf32> -> vector<32x32xf32>
    %148 = arith.addf %143, %147 : vector<32x32xf32>
    %c0_54 = arith.constant 0 : index
    %c0_55 = arith.constant 0 : index
    %149 = vector.load %arg9[%c0_54, %c0_55] : memref<32x32xf32, #tpu.memory_space<vmem>>, vector<32x32xf32>
    tpu.vector_store %arg9[%c0_54, %c0_55], %148 {strides = array<i32>} : memref<32x32xf32, #tpu.memory_space<vmem>>, vector<32x32xf32>,
    %c0_56 = arith.constant 0 : index
    %c0_57 = arith.constant 0 : index
    %150 = vector.load %arg9[%c0_56, %c0_57] : memref<32x32xf32, #tpu.memory_space<vmem>>, vector<32x32xf32>
    %151 = arith.addf %129, %150 : vector<32x32xf32>
    %cst_58 = arith.constant dense<0.000000e+00> : vector<32xf32>
    %152 = vector.multi_reduction <add>, %151, %cst_58 [1] : vector<32x32xf32> to vector<32xf32>
    %153 = vector.shape_cast %152 : vector<32xf32> to vector<32x1xf32>
    %cst_59 = arith.constant 3.200000e+01 : f32
    %154 = vector.broadcast %cst_59 : f32 to vector<32x1xf32>
    %155 = arith.divf %153, %154 : vector<32x1xf32>
    %156 = vector.broadcast %155 : vector<32x1xf32> to vector<32x32xf32>
    %157 = arith.subf %151, %156 : vector<32x32xf32>
    %158 = arith.mulf %157, %157 : vector<32x32xf32>
    %cst_60 = arith.constant dense<0.000000e+00> : vector<32xf32>
    %159 = vector.multi_reduction <add>, %158, %cst_60 [1] : vector<32x32xf32> to vector<32xf32>
    %160 = vector.shape_cast %159 : vector<32xf32> to vector<32x1xf32>
    %cst_61 = arith.constant 3.200000e+01 : f32
    %161 = vector.broadcast %cst_61 : f32 to vector<32x1xf32>
    %162 = arith.divf %160, %161 : vector<32x1xf32>
    %163 = vector.broadcast %155 : vector<32x1xf32> to vector<32x32xf32>
    %164 = arith.subf %151, %163 : vector<32x32xf32>
    %cst_62 = arith.constant 9.99999974E-6 : f32
    %165 = vector.broadcast %cst_62 : f32 to vector<32x1xf32>
    %166 = arith.addf %162, %165 : vector<32x1xf32>
    %167 = math.rsqrt %166 : vector<32x1xf32>
    %168 = vector.broadcast %167 : vector<32x1xf32> to vector<32x32xf32>
    %169 = arith.mulf %164, %168 : vector<32x32xf32>
    %170 = vector.broadcast %9 : vector<1x32xf32> to vector<32x32xf32>
    %171 = arith.mulf %169, %170 : vector<32x32xf32>
    %172 = vector.broadcast %10 : vector<1x32xf32> to vector<32x32xf32>
    %173 = arith.addf %171, %172 : vector<32x32xf32>
    %174 = vector.shape_cast %173 : vector<32x32xf32> to vector<4x8x32xf32>
    %c0_63 = arith.constant 0 : index
    %c0_64 = arith.constant 0 : index
    %c0_65 = arith.constant 0 : index
    %175 = vector.load %arg8[%c0_63, %c0_64, %c0_65] : memref<4x8x32xf32, #tpu.memory_space<vmem>>, vector<4x8x32xf32>
    tpu.vector_store %arg8[%c0_63, %c0_64, %c0_65], %174 {strides = array<i32>} : memref<4x8x32xf32, #tpu.memory_space<vmem>>, vector<4x8x32xf32>,
    return
  }
  func.func @transform_0(%arg0: i32, %arg1: i32) -> (i32, i32, i32) {
    %c0_i32 = arith.constant 0 : i32
    %c0_i32_0 = arith.constant 0 : i32
    %c0_i32_1 = arith.constant 0 : i32
    return %arg0, %c0_i32, %c0_i32_0 : i32, i32, i32
  }
  func.func @transform_1(%arg0: i32, %arg1: i32) -> (i32, i32, i32) {
    %c0_i32 = arith.constant 0 : i32
    %c0_i32_0 = arith.constant 0 : i32
    %c0_i32_1 = arith.constant 0 : i32
    return %arg1, %c0_i32, %c0_i32_0 : i32, i32, i32
  }
  func.func @transform_2(%arg0: i32, %arg1: i32) -> (i32, i32, i32) {
    %c0_i32 = arith.constant 0 : i32
    %c0_i32_0 = arith.constant 0 : i32
    %c0_i32_1 = arith.constant 0 : i32
    return %arg1, %c0_i32, %c0_i32_0 : i32, i32, i32
  }
  func.func @transform_3(%arg0: i32, %arg1: i32) -> (i32, i32, i32) {
    %c0_i32 = arith.constant 0 : i32
    %c0_i32_0 = arith.constant 0 : i32
    %c0_i32_1 = arith.constant 0 : i32
    return %arg1, %c0_i32, %c0_i32_0 : i32, i32, i32
  }
  func.func @transform_4(%arg0: i32, %arg1: i32) -> (i32, i32, i32) {
    %c0_i32 = arith.constant 0 : i32
    %c0_i32_0 = arith.constant 0 : i32
    %c0_i32_1 = arith.constant 0 : i32
    return %arg1, %c0_i32, %c0_i32_0 : i32, i32, i32
  }
  func.func @transform_5(%arg0: i32, %arg1: i32) -> (i32, i32, i32) {
    %c0_i32 = arith.constant 0 : i32
    %c0_i32_0 = arith.constant 0 : i32
    %c0_i32_1 = arith.constant 0 : i32
    return %arg1, %c0_i32, %c0_i32_0 : i32, i32, i32
  }
  func.func @transform_6(%arg0: i32, %arg1: i32) -> (i32, i32, i32) {
    %c0_i32 = arith.constant 0 : i32
    %c0_i32_0 = arith.constant 0 : i32
    %c0_i32_1 = arith.constant 0 : i32
    return %arg0, %c0_i32, %c0_i32_0 : i32, i32, i32
  }
}

</mosaic_0001>

<bundles_post_ra>
// kernel: tpu_custom_call.1
= control target key start
LH: loop header
LB: loop body
LE: loop exit
PB: predicated region body
PF: predicated region fallthrough
CT: control target
= control target key end

     0   :  { %s4196_s0 = inlined_call_operand.vmem [shape: f32[4,8,32], index: 0, kind: input, shape index: {}]   ;;  %s4197_s1 = inlined_call_operand.vmem [shape: bf16[2,32,96], index: 1, kind: input, shape index: {}]   ;;  %s4198_s2 = inlined_call_operand.vmem [shape: bf16[2,32,32], index: 2, kind: input, shape index: {}]   ;;  %s4199_s3 = inlined_call_operand.hbm [shape: bf16[2,32,64], index: 3, kind: input, shape index: {}]   ;;  %s4200_s4 = inlined_call_operand.vmem [shape: bf16[2,64,32], index: 4, kind: input, shape index: {}]   ;;  %s4201_s5 = inlined_call_operand.hbm [shape: f32[2,8,96], index: 5, kind: input, shape index: {}]   ;;  %s4202_s6 = inlined_call_operand.hbm [shape: f32[4,8,32], index: 6, kind: output, shape index: {}]  }
   0x1   :  { %4204 = sst [smem:[#allocation12_spill]] %s4199_s3 }
   0x2   :  { %11 = vsyncpa [#allocation4], 0 }
   0x3   :  { %13 = vsyncpa [#allocation4 + $0x1], 0 }
   0x4   :  { %14 = vsyncpa [#allocation7], 0 }
   0x5   :  { %16 = vsyncpa [#allocation7 + $0x1], 0 }
   0x6   :  { %17 = vsyncpa [#allocation5], 0  ;;  %s3670_s21 = smov 0   ;;  %s3672_s22 = smov 0  }
   0x7   :  { %s3674_s23 = smov 0   ;;  %s3676_s24 = smov 0  }
   0x8   :  { %s3678_s25 = smov 0   ;;  %s3680_s26 = smov 0  }
   0x9 LB: > { %s4203_s27 = sadd.s32 4294967295, %s3611_s26   ;;  %s32_s28 = sadd.s32 1, %s3607_s25  ;;  %s3611_s26 = sphi %s3680_s26, %s23_s26   ;;  %s3607_s25 = sphi %s3678_s25, %s4216_s25   ;;  %s3603_s24 = sphi %s3676_s24, %s4215_s24   ;;  %s3599_s23 = sphi %s3674_s23, %s4214_s23   ;;  %s3595_s22 = sphi %s3672_s22, %s4213_s22   ;;  %s3591_s21 = sphi %s3670_s21, %s4212_s21  }
   0xa   : > { %p33_p0 = scmp.ge.s32.totalorder %s32_s28, 2  ;;  %s120_s29 = sadd.s32 1, %s3599_s23 }
   0xb   : > { %p127_p1 = scmp.ne.s32.totalorder %s3599_s23, %s3595_s22  ;;  %p128_p2 = scmp.eq.s32.totalorder %s3611_s26, 0 }
   0xc   : > { %s4218_s28 = smov (%p33_p0, %s32_s28), 0  ;;  %p133_p4 = scmp.ne.s32.totalorder %s3595_s22, %s3591_s21 }
   0xd   : > { %p3706_p3 = por %p128_p2, %p127_p1  ;;  %s117_s7 = ssub.s32 %s3607_s25, %s4218_s28 }
   0xe   : > { %p134_p5 = scmp.eq.s32.totalorder %s4203_s27, 0  ;;  %p118_p6 = scmp.eq.s32.totalorder %s117_s7, 0 }
   0xf   : > { %p3307_p8 = scmp.lt.s32.totalorder %s3611_s26, 2  ;;  %s3724_s10 = sand.u32 1, %s3599_s23  }
  0x10   : > { %p3715_p7 = por %p134_p5, %p133_p4  ;;  %s2974_s11 = sshll.u32 %s3607_s25, 8 }
  0x11   : > { %s3721_s9 = scalar_select %p118_p6, %s3599_s23, %s120_s29  }
  0x12   : > { %s2901_s12 = sshll.u32 %s3724_s10, 4  ;;  %s4207_s3 = sld [smem:[#allocation12_spill]] }
  0x13   : > { %s264_s16 = scalar_lea.vmem [#allocation3], %s2901_s12  ;;  %p3733_p9 = pnand %p3307_p8, %p3706_p3 }
  0x14   : > { %s271_s17 = sshll.u32 %s264_s16, 4  ;;  %s261_s19 = scalar_lea.sflag [#allocation4], %s3724_s10  ;;  %s272_s17 = int_to_ptr.vmem [resolvable:$true] %s271_s17 }
  0x15   : > { %p3475_p10 = pneg %p3733_p9  ;;  %s3486_s20 = scalar_lea.vmem %s272_s17, 256 }
  0x16   : > { %p3487_p11 = scmp.ne.s32.totalorder %s272_s17, %s3486_s20  ;;  %s3613_s21 = smov [#allocation3]  }
  0x17   : > { %s3491_s29 = sshll.u32 %s3613_s21, 4  ;;  %s3492_s29 = int_to_ptr.vmem [resolvable:$false] %s3491_s29 }
  0x18   : > { %s270_s15 = scalar_lea.hbm %s4207_s3, %s2974_s11  ;;  %p3489_p12 = pnand %p3487_p11, %p3475_p10 }
  0x19   : > { %s3493_s30 = scalar_lea.vmem %s3492_s29, 512  ;;  %p3494_p0 = scmp.lt.s32.totalorder %s272_s17, %s3492_s29 }
  0x1a   : > { %p3490_p13 = pneg %p3489_p12  ;;  %p3495_p1 = scmp.lt.s32.totalorder %s3493_s30, %s3486_s20 }
  0x1c   : > { %p3496_p2 = por %p3495_p1, %p3494_p0 }
  0x1e   : > { %p3497_p3 = pnand %p3496_p2, %p3490_p13 }
  0x20   : > { %3500 = shalt.err (!%p3497_p3)
}
  0x21   : > { %s3614_s7 = smov 64   ;;  %s3615_s11 = smov 4  }
  0x22   : > { %3303 = dma.hbm_to_vmem [thread:$0]  (!%p3733_p9), %s270_s15, 256, %s272_s17, %s261_s19, %s3614_s7, %s3614_s7, %s3615_s11  }
  0x23   : > { %p2906_p4 = scmp.ge.s32.totalorder %s3611_s26, 1  ;;  %p305_p5 = scmp.lt.s32.totalorder %s3611_s26, 3 }
  0x24   : > { %s2904_s12 = sshll.u32 %s3724_s10, 3  ;;  %s2905_s14 = sshll.u32 %s3607_s25, 7 }
  0x25   : > { %p3748_p6 = pnand %p2906_p4, %p305_p5  ;;  %s293_s16 = scalar_lea.vmem [#allocation6], %s2904_s12 }
  0x26   : > { %s300_s20 = sshll.u32 %s293_s16, 4  ;;  %s298_s30 = scalar_lea.hbm %s4201_s5, %s2905_s14  ;;  %s301_s20 = int_to_ptr.vmem [resolvable:$true] %s300_s20 }
  0x27   : > { %s290_s27 = scalar_lea.sflag [#allocation7], %s3724_s10  ;;  %s3514_s3 = scalar_lea.vmem %s301_s20, 128 }
  0x28   : > { %p3515_p8 = scmp.ne.s32.totalorder %s301_s20, %s3514_s3  ;;  %s3616_s15 = smov [#allocation6]  }
  0x29   : > { %s3519_s17 = sshll.u32 %s3616_s15, 4  ;;  %s3520_s17 = int_to_ptr.vmem [resolvable:$false] %s3519_s17 }
  0x2a   : > { %p3517_p11 = pnand %p3515_p8, %p3475_p10  ;;  %s3521_s19 = scalar_lea.vmem %s3520_s17, 256 }
  0x2b   : > { %p3522_p13 = scmp.lt.s32.totalorder %s301_s20, %s3520_s17  ;;  %p3523_p0 = scmp.lt.s32.totalorder %s3521_s19, %s3514_s3 }
  0x2c   : > { %p3518_p12 = pneg %p3517_p11 }
  0x2d   : > { %p3524_p1 = por %p3523_p0, %p3522_p13 }
  0x2f   : > { %p3525_p2 = pnand %p3524_p1, %p3518_p12 }
  0x31   : > { %3528 = shalt.err (!%p3525_p2)
}
  0x32   : > { %3306 = dma.hbm_to_vmem [thread:$0]  (!%p3733_p9), %s298_s30, 128, %s301_s20, %s290_s27  }
  0x33   : > { %309 = sbr.rel (%p3748_p6) target bundleno = 4207 (0x106f), region = 44  ;;  %s311_s10 = sand.u32 (!%p3748_p6), 1, %s3595_s22  }
  0x34   : > { %s2907_s7 = sshll.u32 (!%p3748_p6), %s311_s10, 4  ;;  %s312_s11 = scalar_lea.sflag (!%p3748_p6), [#allocation4], %s311_s10 }
  0x35   : > { %s3765_s12 = scalar_lea.vmem (!%p3748_p6), [#allocation3], %s2907_s7 }
  0x38   : > { %3578 = dma.done.wait (%p3715_p7), %s312_s11, 256  }
  0x39   : > { %3580 = vsyncadd (%p3715_p7), %s312_s11, 4294967040  ;;  %s2908_s3 = sshll.u32 %s311_s10, 3  ;;  %s321_s14 = scalar_lea.sflag [#allocation7], %s311_s10 }
  0x3a   : > { %s3771_s18 = scalar_lea.vmem [#allocation6], %s2908_s3 }
  0x3b   : > { %3582 = dma.done.wait (%p3715_p7), %s321_s14, 128  }
  0x3c   : > { %3584 = vsyncadd (%p3715_p7), %s321_s14, 4294967168  ;;  %p379_p9 = scmp.lt.s32.totalorder %s3603_s24, 1  ;;  %p2915_p7 = scmp.ne.s32.totalorder %s3603_s24, 0 }
  0x3e   : > { %s380_s27 = scalar_select %p379_p9, %s3603_s24, 1 }
  0x3f   : > { %399 = sbr.rel (%p2915_p7) target bundleno = 71 (0x47), region = 56 }
  0x40   : > { %s2975_s13 = sshll.u32 %s380_s27, 4  ;;  %s2977_s16 = sshll.u32 %s380_s27, 5 }
  0x41   : > { %s383_s29 = scalar_lea.vmem %s4197_s1, %s2975_s13  ;;  %s3785_s17 = scalar_lea.vmem %s4198_s2, %s2975_s13 }
  0x42   : > { %s3790_s8 = scalar_lea.vmem %s4200_s4, %s2977_s16 }
  0x44   : > { %v400_v0 = vld [vmem:[%s4196_s0] sm:$0xff]  ;;  %vm404_vm0 = vcmask 261120   ;;  %v401_v1 = vld [vmem:[%s4196_s0 + $0x8] sm:$0xff]  ;;  %v402_v2 = vld [vmem:[%s4196_s0 + $0x10] sm:$0xff] }
  0x45   : > { %405 = vst.msk [vmem:[#allocation8] sm:$0xff] %vm404_vm0, %v400_v0  ;;  %406 = vst.msk [vmem:[#allocation8 + $0x8] sm:$0xff] %vm404_vm0, %v401_v1  ;;  %v403_v3 = vld [vmem:[%s4196_s0 + $0x18] sm:$0xff] }
  0x46   : > { %407 = vst.msk [vmem:[#allocation8 + $0x10] sm:$0xff] %vm404_vm0, %v402_v2  ;;  %408 = vst.msk [vmem:[#allocation8 + $0x18] sm:$0xff] %vm404_vm0, %v403_v3 }
  0x47 PF: > { %v3378_v4 = vld [vmem:[%s383_s29 + $0x8] sm:$0xff]   ;;  %v3379_v5 = vld [vmem:[%s383_s29] sm:$0xff]   ;;  %vm436_vm1 = vcmask 261120   ;;  %v420_v12 = vlaneseq  ;;  %v3617_v16 = vmov 0.0   ;;  %vm3618_vm2 = vmmov 0   ;;  %s3619_s24 = smov 96  }
  0x48   : > { %3064 = vmatprep.subr.bf16.mxu0 %v3378_v4  ;;  %v409_v15 = vld [vmem:[%s3771_s18] sm:$0xff]  ;;  %3072 = vmatprep.subr.bf16.mxu1 %v3617_v16  ;;  %vm506_vm3 = vcmask 64512   ;;  %s3620_s21 = smov 64   ;;  %vm750_vm4 = vcmask 1043456   ;;  %s3621_s29 = smov 88   ;;  %vm1398_vm5 = vcmask 130112  }
  0x49   : > { %3065 = vmatpush3.bf16.msra.mxu0 %v3378_v4  ;;  %v3807_v13 = vshrl.u32 %v420_v12, 7  ;;  %3074 = vmatprep.mubr.msk.bf16.mxu1 %vm3618_vm2, %v3617_v16  ;;  %s3622_s30 = smov 120   ;;  %s3623_s15 = smov 56   ;;  %vm1859_vm6 = vcmask 195712   ;;  %vm2320_vm7 = vcmask 261312   ;;  %vm2606_vm8 = vcmask 523264  }
  0x4a   : > { %3066 = vmatprep.subr.bf16.mxu0 %v3379_v5  ;;  %s3624_s19 = smov 80   ;;  %s3625_s10 = smov 112  }
  0x4b   : > { %v422_v14 = vsub.s32 0, %v3807_v13  ;;  %s3626_s7 = smov 48   ;;  %s3627_s11 = smov 72  }
  0x4c   : > { %v410_v6 = vld [vmem:[#allocation8] sm:$0xff]  ;;  %v411_v7 = vld [vmem:[#allocation8 + $0x8] sm:$0xff]  ;;  %s3628_s3 = smov 104   ;;  %s3629_s14 = smov 40  }
  0x4d   : > { %v414_v8 = vpack.c.bf16 %v411_v7, %v410_v6  ;;  %v412_v9 = vld [vmem:[#allocation8 + $0x10] sm:$0xff]  ;;  %v413_v10 = vld [vmem:[#allocation8 + $0x18] sm:$0xff]  ;;  %3067 = vmatpush3.bf16.msra.mxu0 %v3379_v5  ;;  %v423_v17 = vrot.slane %v409_v15, %v422_v14  ;;  %s3630_s27 = smov 8   ;;  %s3631_s13 = smov 16  }
  0x4e   : > { %v415_v11 = vpack.c.bf16 %v413_v10, %v412_v9  ;;  %3078 = vmatprep.subr.bf16.mxu0 %v3617_v16  ;;  %s3632_s16 = smov 24  }
  0x4f   : > { %3068 = vmatprep.mubr.msk.bf16.mxu0 %vm436_vm1, %v414_v8 }
  0x50   : > { %3069 = vmatmul.mubr.msk.bf16.vlgmr.msra.gmra.mxu0 %vm436_vm1, %v415_v11 }
  0x51   : > { %3080 = vmatprep.mubr.msk.bf16.mxu0 %vm3618_vm2, %v3617_v16 }
 0x110   : > { %v3070_v18 = vpop.f32.mrf.mxu0 }
 0x111   : > { %v486_v19 = vadd.f32 %v3070_v18, %v423_v17 }
 0x112   : > { %v477_v20 = vpop.f32.mrf.mxu0 }
 0x113   : > { %v3817_v21 = vpack.c.bf16 %v486_v19, %v486_v19  ;;  %v478_v22 = vadd.f32 %v477_v20, %v423_v17 }
 0x114   : > { %v3071_v23 = vpop.f32.mrf.mxu0 }
 0x115   : > { %v3819_v24 = vpack.c.bf16 %v478_v22, %v478_v22  ;;  %v489_v25 = vadd.f32 %v3071_v23, %v423_v17  ;;  %601 = vrot.lane.b32.xlu1 %v3817_v21, %s3619_s24 }
 0x116   : > { %v480_v26 = vpop.f32.mrf.mxu0 }
 0x117   : > { %v3822_v27 = vpack.c.bf16 %v489_v25, %v489_v25  ;;  %v481_v28 = vadd.f32 %v480_v26, %v423_v17  ;;  %504 = vrot.lane.b32.xlu0 %v3819_v24, %s3619_s24 }
 0x119   : > { %v3825_v29 = vpack.c.bf16 %v481_v28, %v481_v28  ;;  %649 = vrot.lane.b32.xlu1 %v3822_v27, %s3619_s24 }
 0x11b   : > { %553 = vrot.lane.b32.xlu0 %v3825_v29, %s3619_s24 }
 0x187   : > { %v602_v32 = vpop.permute.xlu1 %601 }
 0x188   : > { %v607_v35 = vsel %vm506_vm3, %v602_v32, 0 }
 0x189   : > { %v505_v30 = vpop.permute.xlu0 %504 }
 0x18a   : > { %v511_v31 = vsel %vm506_vm3, %v505_v30, 0 }
 0x18b   : > { %3073 = vmatpush3.bf16.xpose.msra.mxu1 %v511_v31  ;;  %v650_v36 = vpop.permute.xlu1 %649 }
 0x18c   : > { %3084 = vmatprep.subr.bf16.mxu1 %v3617_v16  ;;  %v655_v37 = vsel %vm506_vm3, %v650_v36, 0 }
 0x18d   : > { %v554_v33 = vpop.permute.xlu0 %553 }
 0x18e   : > { %v559_v34 = vsel %vm506_vm3, %v554_v33, 0 }
 0x18f   : > { %3079 = vmatpush3.bf16.xpose.msra.mxu0 %v559_v34 }
 0x190   : > { %3090 = vmatprep.subr.bf16.mxu0 %v3617_v16 }
 0x192   : > { %3075 = vmatmul.mubr.msk.bf16.vlgmr.msra.gmra.mxu1 %vm506_vm3, %v3819_v24 }
 0x193   : > { %3085 = vmatpush3.bf16.xpose.msra.mxu1 %v607_v35  ;;  %3086 = vmatprep.mubr.msk.bf16.mxu1 %vm3618_vm2, %v3617_v16 }
 0x194   : > { %3096 = vmatprep.subr.bf16.mxu1 %v3617_v16 }
 0x196   : > { %3081 = vmatmul.mubr.msk.bf16.vlgmr.msra.gmra.mxu0 %vm506_vm3, %v3825_v29 }
 0x197   : > { %3091 = vmatpush3.bf16.xpose.msra.mxu0 %v655_v37  ;;  %3092 = vmatprep.mubr.msk.bf16.mxu0 %vm3618_vm2, %v3617_v16 }
 0x198   : > { %3102 = vmatprep.subr.bf16.mxu0 %v3617_v16 }
 0x19a   : > { %3087 = vmatmul.mubr.msk.bf16.vlgmr.msra.gmra.mxu1 %vm506_vm3, %v3817_v21 }
 0x19b   : > { %3098 = vmatprep.mubr.msk.bf16.mxu1 %vm3618_vm2, %v3617_v16 }
 0x19e   : > { %3093 = vmatmul.mubr.msk.bf16.vlgmr.msra.gmra.mxu0 %vm506_vm3, %v3822_v27 }
 0x19f   : > { %3104 = vmatprep.mubr.msk.bf16.mxu0 %vm3618_vm2, %v3617_v16 }
 0x252   : > { %v547_v38 = vpop.f32.mrf.mxu1 }
 0x253   : > { %v697_v39 = vsel %vm506_vm3, %v547_v38, -inf }
 0x254   : > { %698 = vmax.xlane.f32.xlu0 %v697_v39  ;;  %v3076_v40 = vpop.f32.mrf.mxu1 }
 0x256   : > { %v550_v41 = vpop.f32.mrf.mxu1  ;;  %v595_v42 = vpop.f32.mrf.mxu0 }
 0x257   : > { %v700_v43 = vsel %vm506_vm3, %v595_v42, -inf }
 0x258   : > { %v3077_v44 = vpop.f32.mrf.mxu1  ;;  %701 = vmax.xlane.f32.xlu1 %v700_v43  ;;  %v3082_v45 = vpop.f32.mrf.mxu0 }
 0x25a   : > { %v598_v46 = vpop.f32.mrf.mxu0  ;;  %v643_v47 = vpop.f32.mrf.mxu1 }
 0x25b   : > { %v703_v48 = vsel %vm506_vm3, %v643_v47, -inf }
 0x25c   : > { %704 = vmax.xlane.f32.xlu0 %v703_v48  ;;  %v3083_v49 = vpop.f32.mrf.mxu0  ;;  %v3088_v50 = vpop.f32.mrf.mxu1 }
 0x25e   : > { %v646_v51 = vpop.f32.mrf.mxu1  ;;  %v691_v52 = vpop.f32.mrf.mxu0 }
 0x25f   : > { %v706_v53 = vsel %vm506_vm3, %v691_v52, -inf }
 0x260   : > { %v3089_v54 = vpop.f32.mrf.mxu1  ;;  %707 = vmax.xlane.f32.xlu0 %v706_v53  ;;  %v3094_v55 = vpop.f32.mrf.mxu0 }
 0x262   : > { %v694_v56 = vpop.f32.mrf.mxu0 }
 0x264   : > { %v3095_v57 = vpop.f32.mrf.mxu0 }
 0x269   : > { %745 = vrot.lane.b32.xlu1 %v3819_v24, %s3620_s21 }
 0x2dd   : > { %v699_v58 = vpop.xlane.xlu0 %698 }
 0x2de   : > { %v709_v59 = vsub.f32 %v547_v38, %v699_v58 }
 0x2e0   : > { %v713_v60 = vmul.f32 1.442695, %v709_v59 }
 0x2e1   : > { %v702_v61 = vpop.xlane.xlu1 %701 }
 0x2e2   : > { %3388 = vpow2.f32 %v713_v60  ;;  %v710_v62 = vsub.f32 %v595_v42, %v702_v61 }
 0x2e4   : > { %v715_v63 = vmul.f32 1.442695, %v710_v62 }
 0x2e5   : > { %v746_v0 = vpop.permute.xlu1 %745  ;;  %v705_v6 = vpop.xlane.xlu0 %704 }
 0x2e6   : > { %3390 = vpow2.f32 %v715_v63  ;;  %v752_v1 = vsel %vm750_vm4, %v746_v0, 0  ;;  %v711_v8 = vsub.f32 %v643_v47, %v705_v6 }
 0x2e7   : > { %3097 = vmatpush3.bf16.msra.mxu1 %v752_v1 }
 0x2e8   : > { %3108 = vmatprep.subr.bf16.mxu1 %v3617_v16  ;;  %v717_v10 = vmul.f32 1.442695, %v711_v8 }
 0x2e9   : > { %v708_v7 = vpop.xlane.xlu0 %707 }
 0x2ea   : > { %v712_v9 = vsub.f32 %v691_v52, %v708_v7  ;;  %3392 = vpow2.f32 %v717_v10 }
 0x2ec   : > { %v719_v11 = vmul.f32 1.442695, %v712_v9 }
 0x2ee   : > { %3394 = vpow2.f32 %v719_v11 }
 0x2ef   : > { %v3389_v2 = vpop.eup %3388 }
 0x2f0   : > { %v721_v3 = vsel %vm506_vm3, %v3389_v2, 0.0 }
 0x2f1   : > { %722 = vadd.xlane.f32.xlu1 %v721_v3 }
 0x2f3   : > { %v3391_v4 = vpop.eup %3390 }
 0x2f4   : > { %v724_v5 = vsel %vm506_vm3, %v3391_v4, 0.0 }
 0x2f5   : > { %725 = vadd.xlane.f32.xlu0 %v724_v5 }
 0x2f7   : > { %v3393_v12 = vpop.eup %3392 }
 0x2f8   : > { %v727_v15 = vsel %vm506_vm3, %v3393_v12, 0.0 }
 0x2fb   : > { %v3395_v14 = vpop.eup %3394 }
 0x2fc   : > { %v730_v17 = vsel %vm506_vm3, %v3395_v14, 0.0 }
 0x302   : > { %842 = vrot.lane.b32.xlu1 %v3817_v21, %s3620_s21 }
 0x306   : > { %890 = vrot.lane.b32.xlu1 %v3822_v27, %s3620_s21 }
 0x30b   : > { %794 = vrot.lane.b32.xlu0 %v3825_v29, %s3620_s21 }
 0x32a   : > { %728 = vadd.xlane.f32.xlu1 %v727_v15  ;;  %731 = vadd.xlane.f32.xlu0 %v730_v17 }
 0x33b   : > { %994 = vrot.lane.b32.xlu1 %v3825_v29, %s3621_s29 }
 0x33f   : > { %992 = vrot.lane.b32.xlu1 %v3825_v29, %s3622_s30 }
 0x340   : > { %944 = vrot.lane.b32.xlu0 %v3819_v24, %s3621_s29 }
 0x343   : > { %1094 = vrot.lane.b32.xlu1 %v3822_v27, %s3621_s29 }
 0x344   : > { %942 = vrot.lane.b32.xlu0 %v3819_v24, %s3622_s30 }
 0x347   : > { %1092 = vrot.lane.b32.xlu1 %v3822_v27, %s3622_s30 }
 0x348   : > { %1044 = vrot.lane.b32.xlu0 %v3817_v21, %s3621_s29 }
 0x34c   : > { %1042 = vrot.lane.b32.xlu0 %v3817_v21, %s3622_s30 }
 0x37a   : > { %v723_v18 = vpop.xlane.xlu1 %722 }
 0x37b   : > { %3396 = vrcp.f32 %v723_v18 }
 0x37e   : > { %v726_v19 = vpop.xlane.xlu0 %725  ;;  %v843_v25 = vpop.permute.xlu1 %842 }
 0x37f   : > { %3398 = vrcp.f32 %v726_v19  ;;  %v848_v31 = vsel %vm750_vm4, %v843_v25, 0 }
 0x382   : > { %v795_v20 = vpop.permute.xlu0 %794  ;;  %v891_v33 = vpop.permute.xlu1 %890 }
 0x383   : > { %v800_v22 = vsel %vm750_vm4, %v795_v20, 0  ;;  %v896_v35 = vsel %vm750_vm4, %v891_v33, 0 }
 0x384   : > { %3103 = vmatpush3.bf16.msra.mxu0 %v800_v22 }
 0x385   : > { %3114 = vmatprep.subr.bf16.mxu0 %v3617_v16 }
 0x388   : > { %v3397_v23 = vpop.eup %3396 }
 0x389   : > { %v737_v26 = vmul.f32 %v3397_v23, %v3389_v2 }
 0x38b   : > { %v741_v28 = vpack.c.bf16 %v737_v26, %v737_v26 }
 0x38c   : > { %v3399_v30 = vpop.eup %3398 }
 0x38d   : > { %3099 = vmatmul.mubr.msk.bf16.vlgmr.msra.gmra.mxu1 %vm506_vm3, %v741_v28  ;;  %v738_v32 = vmul.f32 %v3399_v30, %v3391_v4 }
 0x38e   : > { %3109 = vmatpush3.bf16.msra.mxu1 %v848_v31  ;;  %3110 = vmatprep.mubr.msk.bf16.mxu1 %vm3618_vm2, %v3617_v16 }
 0x38f   : > { %v742_v34 = vpack.c.bf16 %v738_v32, %v738_v32  ;;  %3120 = vmatprep.subr.bf16.mxu1 %v3617_v16 }
 0x391   : > { %3105 = vmatmul.mubr.msk.bf16.vlgmr.msra.gmra.mxu0 %vm506_vm3, %v742_v34 }
 0x392   : > { %3115 = vmatpush3.bf16.msra.mxu0 %v896_v35  ;;  %3116 = vmatprep.mubr.msk.bf16.mxu0 %vm3618_vm2, %v3617_v16 }
 0x393   : > { %3126 = vmatprep.subr.bf16.mxu0 %v3617_v16 }
 0x3b3   : > { %v729_v36 = vpop.xlane.xlu1 %728  ;;  %v732_v37 = vpop.xlane.xlu0 %731 }
 0x3b4   : > { %3400 = vrcp.f32 %v729_v36 }
 0x3b5   : > { %3402 = vrcp.f32 %v732_v37 }
 0x3b7   : > { %v945_v38 = vpop.permute.xlu0 %944  ;;  %v995_v39 = vpop.permute.xlu1 %994 }
 0x3b8   : > { %v950_v47 = vsel %vm506_vm3, %v945_v38, 0  ;;  %v1000_v49 = vsel %vm506_vm3, %v995_v39, 0 }
 0x3bb   : > { %v943_v45 = vpop.permute.xlu0 %942  ;;  %v993_v48 = vpop.permute.xlu1 %992 }
 0x3bf   : > { %v1045_v50 = vpop.permute.xlu0 %1044  ;;  %v1095_v51 = vpop.permute.xlu1 %1094 }
 0x3c0   : > { %v1050_v52 = vsel %vm506_vm3, %v1045_v50, 0  ;;  %v1100_v53 = vsel %vm506_vm3, %v1095_v51, 0 }
 0x3c1   : > { %v3401_v40 = vpop.eup %3400 }
 0x3c2   : > { %v3403_v41 = vpop.eup %3402  ;;  %v739_v42 = vmul.f32 %v3401_v40, %v3393_v12 }
 0x3c3   : > { %v740_v43 = vmul.f32 %v3403_v41, %v3395_v14  ;;  %v1043_v54 = vpop.permute.xlu0 %1042  ;;  %v1093_v55 = vpop.permute.xlu1 %1092 }
 0x3c4   : > { %v743_v44 = vpack.c.bf16 %v739_v42, %v739_v42 }
 0x3c5   : > { %v744_v46 = vpack.c.bf16 %v740_v43, %v740_v43 }
 0x3c6   : > { %3111 = vmatmul.mubr.msk.bf16.vlgmr.msra.gmra.mxu1 %vm506_vm3, %v743_v44 }
 0x3c7   : > { %3117 = vmatmul.mubr.msk.bf16.vlgmr.msra.gmra.mxu0 %vm506_vm3, %v744_v46  ;;  %3121 = vmatpush3.bf16.xpose.msra.mxu1 %v950_v47 }
 0x3c8   : > { %3127 = vmatpush3.bf16.xpose.msra.mxu0 %v1000_v49  ;;  %3122 = vmatprep.mubr.msk.bf16.mxu1 %vm3618_vm2, %v3617_v16 }
 0x3c9   : > { %3128 = vmatprep.mubr.msk.bf16.mxu0 %vm3618_vm2, %v3617_v16  ;;  %3132 = vmatprep.subr.bf16.mxu1 %v3617_v16 }
 0x3ca   : > { %3138 = vmatprep.subr.bf16.mxu0 %v3617_v16 }
 0x3ce   : > { %3123 = vmatmul.mubr.msk.bf16.vlgmr.msra.gmra.mxu1 %vm506_vm3, %v943_v45 }
 0x3cf   : > { %3129 = vmatmul.mubr.msk.bf16.vlgmr.msra.gmra.mxu0 %vm506_vm3, %v993_v48  ;;  %3133 = vmatpush3.bf16.xpose.msra.mxu1 %v1050_v52 }
 0x3d0   : > { %3139 = vmatpush3.bf16.xpose.msra.mxu0 %v1100_v53  ;;  %3134 = vmatprep.mubr.msk.bf16.mxu1 %vm3618_vm2, %v3617_v16 }
 0x3d1   : > { %3140 = vmatprep.mubr.msk.bf16.mxu0 %vm3618_vm2, %v3617_v16  ;;  %3144 = vmatprep.subr.bf16.mxu1 %v3617_v16 }
 0x3d2   : > { %3150 = vmatprep.subr.bf16.mxu0 %v3617_v16 }
 0x3d6   : > { %3135 = vmatmul.mubr.msk.bf16.vlgmr.msra.gmra.mxu1 %vm506_vm3, %v1043_v54 }
 0x3d7   : > { %3141 = vmatmul.mubr.msk.bf16.vlgmr.msra.gmra.mxu0 %vm506_vm3, %v1093_v55  ;;  %3146 = vmatprep.mubr.msk.bf16.mxu1 %vm3618_vm2, %v3617_v16 }
 0x3d8   : > { %3152 = vmatprep.mubr.msk.bf16.mxu0 %vm3618_vm2, %v3617_v16 }
 0x44d   : > { %v788_v56 = vpop.f32.mrf.mxu1 }
 0x44e   : > { %938 = vst.msk [vmem:[#allocation2] sm:$0xff] %vm506_vm3, %v788_v56 }
 0x44f   : > { %v3100_v57 = vpop.f32.mrf.mxu1 }
 0x451   : > { %v791_v58 = vpop.f32.mrf.mxu1  ;;  %v836_v59 = vpop.f32.mrf.mxu0 }
 0x452   : > { %939 = vst.msk [vmem:[#allocation2 + $0x8] sm:$0xff] %vm506_vm3, %v836_v59 }
 0x453   : > { %v3101_v60 = vpop.f32.mrf.mxu1  ;;  %v3106_v61 = vpop.f32.mrf.mxu0 }
 0x455   : > { %v839_v62 = vpop.f32.mrf.mxu0 }
 0x457   : > { %v3107_v63 = vpop.f32.mrf.mxu0 }
 0x486   : > { %v884_v0 = vpop.f32.mrf.mxu1 }
 0x487   : > { %940 = vst.msk [vmem:[#allocation2 + $0x10] sm:$0xff] %vm506_vm3, %v884_v0  ;;  %v932_v1 = vpop.f32.mrf.mxu0 }
 0x488   : > { %941 = vst.msk [vmem:[#allocation2 + $0x18] sm:$0xff] %vm506_vm3, %v932_v1  ;;  %v3112_v2 = vpop.f32.mrf.mxu1 }
 0x489   : > { %v3118_v3 = vpop.f32.mrf.mxu0 }
 0x48a   : > { %v887_v4 = vpop.f32.mrf.mxu1 }
 0x48b   : > { %v935_v5 = vpop.f32.mrf.mxu0 }
 0x48c   : > { %v3113_v6 = vpop.f32.mrf.mxu1 }
 0x48d   : > { %v3119_v7 = vpop.f32.mrf.mxu0 }
 0x48e   : > { %v986_v8 = vpop.f32.mrf.mxu1 }
 0x48f   : > { %v1036_v9 = vpop.f32.mrf.mxu0  ;;  %v1142_v10 = vsel %vm506_vm3, %v986_v8, -inf }
 0x490   : > { %v1145_v11 = vsel %vm506_vm3, %v1036_v9, -inf  ;;  %1143 = vmax.xlane.f32.xlu0 %v1142_v10  ;;  %v3124_v12 = vpop.f32.mrf.mxu1 }
 0x491   : > { %1146 = vmax.xlane.f32.xlu1 %v1145_v11  ;;  %v3130_v14 = vpop.f32.mrf.mxu0 }
 0x492   : > { %v989_v15 = vpop.f32.mrf.mxu1 }
 0x493   : > { %v1039_v17 = vpop.f32.mrf.mxu0 }
 0x494   : > { %v3125_v18 = vpop.f32.mrf.mxu1 }
 0x495   : > { %v3131_v19 = vpop.f32.mrf.mxu0 }
 0x496   : > { %v1086_v20 = vpop.f32.mrf.mxu1 }
 0x497   : > { %v1136_v22 = vpop.f32.mrf.mxu0  ;;  %v1148_v23 = vsel %vm506_vm3, %v1086_v20, -inf }
 0x498   : > { %1149 = vmax.xlane.f32.xlu0 %v1148_v23  ;;  %v3136_v25 = vpop.f32.mrf.mxu1  ;;  %v1151_v31 = vsel %vm506_vm3, %v1136_v22, -inf }
 0x499   : > { %v3142_v26 = vpop.f32.mrf.mxu0 }
 0x49a   : > { %v1089_v28 = vpop.f32.mrf.mxu1 }
 0x49b   : > { %v1139_v30 = vpop.f32.mrf.mxu0 }
 0x49c   : > { %1152 = vmax.xlane.f32.xlu0 %v1151_v31  ;;  %v3137_v32 = vpop.f32.mrf.mxu1 }
 0x49d   : > { %v3143_v33 = vpop.f32.mrf.mxu0 }
 0x4a2   : > { %1190 = vrot.lane.b32.xlu1 %v3819_v24, %s3623_s15 }
 0x519   : > { %v1144_v34 = vpop.xlane.xlu0 %1143 }
 0x51a   : > { %v1147_v35 = vpop.xlane.xlu1 %1146  ;;  %v1154_v36 = vsub.f32 %v986_v8, %v1144_v34 }
 0x51b   : > { %v1155_v37 = vsub.f32 %v1036_v9, %v1147_v35 }
 0x51c   : > { %v1158_v38 = vmul.f32 1.442695, %v1154_v36 }
 0x51d   : > { %v1160_v39 = vmul.f32 1.442695, %v1155_v37 }
 0x51e   : > { %3404 = vpow2.f32 %v1158_v38  ;;  %v1191_v40 = vpop.permute.xlu1 %1190 }
 0x51f   : > { %3406 = vpow2.f32 %v1160_v39  ;;  %v1196_v41 = vsel %vm750_vm4, %v1191_v40, 0 }
 0x520   : > { %3145 = vmatpush3.bf16.msra.mxu1 %v1196_v41 }
 0x521   : > { %3156 = vmatprep.subr.bf16.mxu1 %v3617_v16  ;;  %v1150_v46 = vpop.xlane.xlu0 %1149 }
 0x522   : > { %v1156_v49 = vsub.f32 %v1086_v20, %v1150_v46 }
 0x524   : > { %v1162_v51 = vmul.f32 1.442695, %v1156_v49 }
 0x525   : > { %v1153_v47 = vpop.xlane.xlu0 %1152 }
 0x526   : > { %v1157_v48 = vsub.f32 %v1136_v22, %v1153_v47 }
 0x528   : > { %v1164_v50 = vmul.f32 1.442695, %v1157_v48 }
 0x52a   : > { %3408 = vpow2.f32 %v1164_v50 }
 0x52b   : > { %v3405_v42 = vpop.eup %3404  ;;  %3410 = vpow2.f32 %v1162_v51 }
 0x52c   : > { %v3407_v43 = vpop.eup %3406  ;;  %v1166_v44 = vsel %vm506_vm3, %v3405_v42, 0.0 }
 0x52d   : > { %v1169_v45 = vsel %vm506_vm3, %v3407_v43, 0.0  ;;  %1167 = vadd.xlane.f32.xlu1 %v1166_v44 }
 0x52e   : > { %1170 = vadd.xlane.f32.xlu0 %v1169_v45 }
 0x537   : > { %v3409_v52 = vpop.eup %3408 }
 0x538   : > { %v3411_v53 = vpop.eup %3410  ;;  %v1175_v54 = vsel %vm506_vm3, %v3409_v52, 0.0 }
 0x539   : > { %v1172_v55 = vsel %vm506_vm3, %v3411_v53, 0.0 }
 0x53e   : > { %1286 = vrot.lane.b32.xlu1 %v3817_v21, %s3623_s15 }
 0x542   : > { %1334 = vrot.lane.b32.xlu1 %v3822_v27, %s3623_s15 }
 0x544   : > { %1238 = vrot.lane.b32.xlu0 %v3825_v29, %s3623_s15 }
 0x563   : > { %1176 = vadd.xlane.f32.xlu0 %v1175_v54 }
 0x566   : > { %1173 = vadd.xlane.f32.xlu1 %v1172_v55 }
 0x577   : > { %1455 = vrot.lane.b32.xlu1 %v3825_v29, %s3624_s19 }
 0x579   : > { %1405 = vrot.lane.b32.xlu0 %v3819_v24, %s3624_s19 }
 0x57b   : > { %1453 = vrot.lane.b32.xlu1 %v3825_v29, %s3625_s10 }
 0x57d   : > { %1403 = vrot.lane.b32.xlu0 %v3819_v24, %s3625_s10 }
 0x57f   : > { %1555 = vrot.lane.b32.xlu1 %v3822_v27, %s3624_s19 }
 0x581   : > { %1505 = vrot.lane.b32.xlu0 %v3817_v21, %s3624_s19 }
 0x583   : > { %1553 = vrot.lane.b32.xlu1 %v3822_v27, %s3625_s10 }
 0x585   : > { %1503 = vrot.lane.b32.xlu0 %v3817_v21, %s3625_s10 }
 0x5b6   : > { %v1168_v56 = vpop.xlane.xlu1 %1167 }
 0x5b7   : > { %3412 = vrcp.f32 %v1168_v56  ;;  %v1171_v57 = vpop.xlane.xlu0 %1170 }
 0x5b8   : > { %3414 = vrcp.f32 %v1171_v57 }
 0x5ba   : > { %v1287_v60 = vpop.permute.xlu1 %1286 }
 0x5bb   : > { %v1239_v58 = vpop.permute.xlu0 %1238  ;;  %v1292_v4 = vsel %vm750_vm4, %v1287_v60, 0 }
 0x5bc   : > { %v1244_v59 = vsel %vm750_vm4, %v1239_v58, 0 }
 0x5bd   : > { %3151 = vmatpush3.bf16.msra.mxu0 %v1244_v59 }
 0x5be   : > { %3162 = vmatprep.subr.bf16.mxu0 %v3617_v16  ;;  %v1335_v1 = vpop.permute.xlu1 %1334 }
 0x5bf   : > { %v1340_v5 = vsel %vm750_vm4, %v1335_v1, 0 }
 0x5c4   : > { %v3413_v61 = vpop.eup %3412 }
 0x5c5   : > { %v3415_v62 = vpop.eup %3414  ;;  %v1182_v63 = vmul.f32 %v3413_v61, %v3405_v42 }
 0x5c6   : > { %v1183_v0 = vmul.f32 %v3415_v62, %v3407_v43 }
 0x5c7   : > { %v1186_v2 = vpack.c.bf16 %v1182_v63, %v1182_v63 }
 0x5c8   : > { %v1187_v3 = vpack.c.bf16 %v1183_v0, %v1183_v0 }
 0x5c9   : > { %3147 = vmatmul.mubr.msk.bf16.vlgmr.msra.gmra.mxu1 %vm506_vm3, %v1186_v2 }
 0x5ca   : > { %3153 = vmatmul.mubr.msk.bf16.vlgmr.msra.gmra.mxu0 %vm506_vm3, %v1187_v3  ;;  %3157 = vmatpush3.bf16.msra.mxu1 %v1292_v4 }
 0x5cb   : > { %3163 = vmatpush3.bf16.msra.mxu0 %v1340_v5  ;;  %3164 = vmatprep.mubr.msk.bf16.mxu0 %vm3618_vm2, %v3617_v16 }
 0x5cc   : > { %3174 = vmatprep.subr.bf16.mxu0 %v3617_v16  ;;  %3158 = vmatprep.mubr.msk.bf16.mxu1 %vm3618_vm2, %v3617_v16 }
 0x5cd   : > { %3168 = vmatprep.subr.bf16.mxu1 %v3617_v16 }
 0x5ec   : > { %v1177_v6 = vpop.xlane.xlu0 %1176 }
 0x5ed   : > { %3416 = vrcp.f32 %v1177_v6 }
 0x5ef   : > { %v1174_v7 = vpop.xlane.xlu1 %1173 }
 0x5f0   : > { %3418 = vrcp.f32 %v1174_v7  ;;  %v1406_v10 = vpop.permute.xlu0 %1405 }
 0x5f1   : > { %v1411_v22 = vsel %vm506_vm3, %v1406_v10, 0 }
 0x5f3   : > { %v1456_v8 = vpop.permute.xlu1 %1455 }
 0x5f4   : > { %v1461_v18 = vsel %vm506_vm3, %v1456_v8, 0  ;;  %v1404_v20 = vpop.permute.xlu0 %1403 }
 0x5f7   : > { %v1454_v15 = vpop.permute.xlu1 %1453 }
 0x5f8   : > { %v1506_v25 = vpop.permute.xlu0 %1505 }
 0x5f9   : > { %v1511_v28 = vsel %vm506_vm3, %v1506_v25, 0 }
 0x5fa   : > { %v3417_v9 = vpop.eup %3416 }
 0x5fb   : > { %v1185_v11 = vmul.f32 %v3417_v9, %v3409_v52  ;;  %v1556_v23 = vpop.permute.xlu1 %1555 }
 0x5fc   : > { %v1561_v26 = vsel %vm506_vm3, %v1556_v23, 0  ;;  %v1504_v31 = vpop.permute.xlu0 %1503 }
 0x5fd   : > { %v3419_v12 = vpop.eup %3418  ;;  %v1189_v14 = vpack.c.bf16 %v1185_v11, %v1185_v11 }
 0x5fe   : > { %v1184_v17 = vmul.f32 %v3419_v12, %v3411_v53 }
 0x5ff   : > { %3165 = vmatmul.mubr.msk.bf16.vlgmr.msra.gmra.mxu0 %vm506_vm3, %v1189_v14  ;;  %v1554_v30 = vpop.permute.xlu1 %1553 }
 0x600   : > { %3175 = vmatpush3.bf16.xpose.msra.mxu0 %v1461_v18  ;;  %v1188_v19 = vpack.c.bf16 %v1184_v17, %v1184_v17  ;;  %3176 = vmatprep.mubr.msk.bf16.mxu0 %vm3618_vm2, %v3617_v16 }
 0x601   : > { %3186 = vmatprep.subr.bf16.mxu0 %v3617_v16 }
 0x602   : > { %3159 = vmatmul.mubr.msk.bf16.vlgmr.msra.gmra.mxu1 %vm506_vm3, %v1188_v19 }
 0x603   : > { %3169 = vmatpush3.bf16.xpose.msra.mxu1 %v1411_v22  ;;  %3170 = vmatprep.mubr.msk.bf16.mxu1 %vm3618_vm2, %v3617_v16 }
 0x604   : > { %3180 = vmatprep.subr.bf16.mxu1 %v3617_v16 }
 0x607   : > { %3177 = vmatmul.mubr.msk.bf16.vlgmr.msra.gmra.mxu0 %vm506_vm3, %v1454_v15 }
 0x608   : > { %3187 = vmatpush3.bf16.xpose.msra.mxu0 %v1561_v26  ;;  %3188 = vmatprep.mubr.msk.bf16.mxu0 %vm3618_vm2, %v3617_v16 }
 0x609   : > { %3198 = vmatprep.subr.bf16.mxu0 %v3617_v16 }
 0x60a   : > { %3171 = vmatmul.mubr.msk.bf16.vlgmr.msra.gmra.mxu1 %vm506_vm3, %v1404_v20 }
 0x60b   : > { %3181 = vmatpush3.bf16.xpose.msra.mxu1 %v1511_v28  ;;  %3182 = vmatprep.mubr.msk.bf16.mxu1 %vm3618_vm2, %v3617_v16 }
 0x60c   : > { %3192 = vmatprep.subr.bf16.mxu1 %v3617_v16 }
 0x60f   : > { %3189 = vmatmul.mubr.msk.bf16.vlgmr.msra.gmra.mxu0 %vm506_vm3, %v1554_v30 }
 0x610   : > { %3200 = vmatprep.mubr.msk.bf16.mxu0 %vm3618_vm2, %v3617_v16 }
 0x612   : > { %3183 = vmatmul.mubr.msk.bf16.vlgmr.msra.gmra.mxu1 %vm506_vm3, %v1504_v31 }
 0x613   : > { %3194 = vmatprep.mubr.msk.bf16.mxu1 %vm3618_vm2, %v3617_v16 }
 0x689   : > { %v3977_v32 = vpop.f32.mrf.mxu1 }
 0x68a   : > { %v3979_v33 = vpop.f32.mrf.mxu0 }
 0x68b   : > { %v3148_v34 = vpop.f32.mrf.mxu1 }
 0x68c   : > { %v3154_v35 = vpop.f32.mrf.mxu0 }
 0x68d   : > { %v1235_v36 = vpop.f32.mrf.mxu1 }
 0x68e   : > { %v1283_v37 = vpop.f32.mrf.mxu0 }
 0x68f   : > { %v3149_v38 = vpop.f32.mrf.mxu1 }
 0x690   : > { %v3155_v39 = vpop.f32.mrf.mxu0 }
 0x6bf   : > { %v3981_v40 = vpop.f32.mrf.mxu0 }
 0x6c1   : > { %v3166_v41 = vpop.f32.mrf.mxu0 }
 0x6c2   : > { %v3983_v42 = vpop.f32.mrf.mxu1 }
 0x6c3   : > { %v1379_v43 = vpop.f32.mrf.mxu0 }
 0x6c4   : > { %v3160_v44 = vpop.f32.mrf.mxu1 }
 0x6c5   : > { %v3167_v45 = vpop.f32.mrf.mxu0 }
 0x6c6   : > { %v1331_v46 = vpop.f32.mrf.mxu1 }
 0x6c7   : > { %v1497_v47 = vpop.f32.mrf.mxu0 }
 0x6c8   : > { %v3161_v48 = vpop.f32.mrf.mxu1  ;;  %v1606_v49 = vsel %vm506_vm3, %v1497_v47, -inf }
 0x6c9   : > { %1607 = vmax.xlane.f32.xlu1 %v1606_v49  ;;  %v3178_v50 = vpop.f32.mrf.mxu0 }
 0x6ca   : > { %v1447_v51 = vpop.f32.mrf.mxu1 }
 0x6cb   : > { %v1500_v52 = vpop.f32.mrf.mxu0  ;;  %v1603_v53 = vsel %vm506_vm3, %v1447_v51, -inf }
 0x6cc   : > { %1604 = vmax.xlane.f32.xlu0 %v1603_v53  ;;  %v3172_v54 = vpop.f32.mrf.mxu1 }
 0x6cd   : > { %v3179_v55 = vpop.f32.mrf.mxu0 }
 0x6ce   : > { %v1450_v56 = vpop.f32.mrf.mxu1 }
 0x6cf   : > { %v1597_v57 = vpop.f32.mrf.mxu0 }
 0x6d0   : > { %v3173_v58 = vpop.f32.mrf.mxu1  ;;  %v1612_v2 = vsel %vm506_vm3, %v1597_v57, -inf }
 0x6d1   : > { %v3190_v59 = vpop.f32.mrf.mxu0 }
 0x6d2   : > { %v1547_v60 = vpop.f32.mrf.mxu1 }
 0x6d3   : > { %v1600_v61 = vpop.f32.mrf.mxu0  ;;  %v1609_v62 = vsel %vm506_vm3, %v1547_v60, -inf }
 0x6d4   : > { %1610 = vmax.xlane.f32.xlu0 %v1609_v62  ;;  %v3184_v63 = vpop.f32.mrf.mxu1 }
 0x6d5   : > { %v3191_v0 = vpop.f32.mrf.mxu0 }
 0x6d6   : > { %v1550_v1 = vpop.f32.mrf.mxu1 }
 0x6d8   : > { %1613 = vmax.xlane.f32.xlu0 %v1612_v2  ;;  %v3185_v3 = vpop.f32.mrf.mxu1 }
 0x6da   : > { %1651 = vrot.lane.b32.xlu1 %v3819_v24, %s3626_s7 }
 0x752   : > { %v1608_v4 = vpop.xlane.xlu1 %1607 }
 0x753   : > { %v1616_v5 = vsub.f32 %v1497_v47, %v1608_v4 }
 0x755   : > { %v1621_v6 = vmul.f32 1.442695, %v1616_v5  ;;  %v1605_v7 = vpop.xlane.xlu0 %1604 }
 0x756   : > { %v1652_v8 = vpop.permute.xlu1 %1651  ;;  %v1615_v9 = vsub.f32 %v1447_v51, %v1605_v7 }
 0x757   : > { %3420 = vpow2.f32 %v1621_v6  ;;  %v1657_v10 = vsel %vm750_vm4, %v1652_v8, 0 }
 0x758   : > { %v1619_v11 = vmul.f32 1.442695, %v1615_v9  ;;  %3193 = vmatpush3.bf16.msra.mxu1 %v1657_v10 }
 0x759   : > { %3204 = vmatprep.subr.bf16.mxu1 %v3617_v16 }
 0x75a   : > { %3422 = vpow2.f32 %v1619_v11 }
 0x75d   : > { %v1611_v18 = vpop.xlane.xlu0 %1610 }
 0x75e   : > { %v1617_v23 = vsub.f32 %v1547_v60, %v1611_v18 }
 0x760   : > { %v1623_v25 = vmul.f32 1.442695, %v1617_v23 }
 0x761   : > { %v1614_v19 = vpop.xlane.xlu0 %1613 }
 0x762   : > { %v1618_v20 = vsub.f32 %v1597_v57, %v1614_v19 }
 0x764   : > { %v3421_v12 = vpop.eup %3420  ;;  %v1625_v22 = vmul.f32 1.442695, %v1618_v20 }
 0x765   : > { %v1630_v14 = vsel %vm506_vm3, %v3421_v12, 0.0 }
 0x766   : > { %1631 = vadd.xlane.f32.xlu0 %v1630_v14  ;;  %3424 = vpow2.f32 %v1625_v22 }
 0x767   : > { %v3423_v15 = vpop.eup %3422  ;;  %3426 = vpow2.f32 %v1623_v25 }
 0x768   : > { %v1627_v17 = vsel %vm506_vm3, %v3423_v15, 0.0 }
 0x769   : > { %1628 = vadd.xlane.f32.xlu1 %v1627_v17 }
 0x773   : > { %v3425_v26 = vpop.eup %3424 }
 0x774   : > { %v1636_v28 = vsel %vm506_vm3, %v3425_v26, 0.0  ;;  %v3427_v30 = vpop.eup %3426 }
 0x775   : > { %v1633_v31 = vsel %vm506_vm3, %v3427_v30, 0.0 }
 0x77a   : > { %1747 = vrot.lane.b32.xlu1 %v3817_v21, %s3626_s7 }
 0x77c   : > { %1699 = vrot.lane.b32.xlu0 %v3825_v29, %s3626_s7 }
 0x77e   : > { %1795 = vrot.lane.b32.xlu1 %v3822_v27, %s3626_s7 }
 0x79b   : > { %1637 = vadd.xlane.f32.xlu0 %v1636_v28 }
 0x7a2   : > { %1634 = vadd.xlane.f32.xlu1 %v1633_v31 }
 0x7b1   : > { %1866 = vrot.lane.b32.xlu0 %v3819_v24, %s3627_s11 }
 0x7b3   : > { %1916 = vrot.lane.b32.xlu1 %v3825_v29, %s3627_s11 }
 0x7b5   : > { %1864 = vrot.lane.b32.xlu0 %v3819_v24, %s3628_s3 }
 0x7b7   : > { %1914 = vrot.lane.b32.xlu1 %v3825_v29, %s3628_s3 }
 0x7b9   : > { %1966 = vrot.lane.b32.xlu0 %v3817_v21, %s3627_s11 }
 0x7bb   : > { %2016 = vrot.lane.b32.xlu1 %v3822_v27, %s3627_s11 }
 0x7bd   : > { %1964 = vrot.lane.b32.xlu0 %v3817_v21, %s3628_s3 }
 0x7bf   : > { %2014 = vrot.lane.b32.xlu1 %v3822_v27, %s3628_s3 }
 0x7ef   : > { %v1632_v34 = vpop.xlane.xlu0 %1631 }
 0x7f0   : > { %3428 = vrcp.f32 %v1632_v34 }
 0x7f2   : > { %v1629_v35 = vpop.xlane.xlu1 %1628 }
 0x7f3   : > { %3430 = vrcp.f32 %v1629_v35  ;;  %v1700_v36 = vpop.permute.xlu0 %1699 }
 0x7f4   : > { %v1705_v37 = vsel %vm750_vm4, %v1700_v36, 0 }
 0x7f5   : > { %3199 = vmatpush3.bf16.msra.mxu0 %v1705_v37 }
 0x7f6   : > { %3210 = vmatprep.subr.bf16.mxu0 %v3617_v16  ;;  %v1748_v38 = vpop.permute.xlu1 %1747 }
 0x7f7   : > { %v1753_v49 = vsel %vm750_vm4, %v1748_v38, 0 }
 0x7fa   : > { %v1796_v43 = vpop.permute.xlu1 %1795 }
 0x7fb   : > { %v1801_v47 = vsel %vm750_vm4, %v1796_v43, 0 }
 0x7fd   : > { %v3429_v39 = vpop.eup %3428 }
 0x7fe   : > { %v1644_v41 = vmul.f32 %v3429_v39, %v3421_v12 }
 0x800   : > { %v3431_v44 = vpop.eup %3430  ;;  %v1648_v45 = vpack.c.bf16 %v1644_v41, %v1644_v41 }
 0x801   : > { %v1643_v46 = vmul.f32 %v3431_v44, %v3423_v15 }
 0x802   : > { %3201 = vmatmul.mubr.msk.bf16.vlgmr.msra.gmra.mxu0 %vm506_vm3, %v1648_v45 }
 0x803   : > { %3211 = vmatpush3.bf16.msra.mxu0 %v1801_v47  ;;  %v1647_v48 = vpack.c.bf16 %v1643_v46, %v1643_v46  ;;  %3212 = vmatprep.mubr.msk.bf16.mxu0 %vm3618_vm2, %v3617_v16 }
 0x804   : > { %3222 = vmatprep.subr.bf16.mxu0 %v3617_v16 }
 0x805   : > { %3195 = vmatmul.mubr.msk.bf16.vlgmr.msra.gmra.mxu1 %vm506_vm3, %v1647_v48 }
 0x806   : > { %3205 = vmatpush3.bf16.msra.mxu1 %v1753_v49  ;;  %3206 = vmatprep.mubr.msk.bf16.mxu1 %vm3618_vm2, %v3617_v16 }
 0x807   : > { %3216 = vmatprep.subr.bf16.mxu1 %v3617_v16 }
 0x824   : > { %v1638_v50 = vpop.xlane.xlu0 %1637 }
 0x825   : > { %3432 = vrcp.f32 %v1638_v50 }
 0x828   : > { %v1867_v57 = vpop.permute.xlu0 %1866 }
 0x829   : > { %v1872_v0 = vsel %vm506_vm3, %v1867_v57, 0 }
 0x82b   : > { %v1635_v51 = vpop.xlane.xlu1 %1634 }
 0x82c   : > { %3434 = vrcp.f32 %v1635_v51  ;;  %v1865_v63 = vpop.permute.xlu0 %1864 }
 0x82f   : > { %v1917_v52 = vpop.permute.xlu1 %1916 }
 0x830   : > { %v1922_v58 = vsel %vm506_vm3, %v1917_v52, 0  ;;  %v1967_v2 = vpop.permute.xlu0 %1966 }
 0x831   : > { %v1972_v3 = vsel %vm506_vm3, %v1967_v2, 0 }
 0x832   : > { %v3433_v53 = vpop.eup %3432 }
 0x833   : > { %v1646_v54 = vmul.f32 %v3433_v53, %v3425_v26  ;;  %v1915_v56 = vpop.permute.xlu1 %1914 }
 0x834   : > { %v1965_v5 = vpop.permute.xlu0 %1964 }
 0x835   : > { %v1650_v55 = vpack.c.bf16 %v1646_v54, %v1646_v54 }
 0x837   : > { %3213 = vmatmul.mubr.msk.bf16.vlgmr.msra.gmra.mxu0 %vm506_vm3, %v1650_v55  ;;  %v2017_v61 = vpop.permute.xlu1 %2016 }
 0x838   : > { %3223 = vmatpush3.bf16.xpose.msra.mxu0 %v1922_v58  ;;  %3224 = vmatprep.mubr.msk.bf16.mxu0 %vm3618_vm2, %v3617_v16  ;;  %v2022_v1 = vsel %vm506_vm3, %v2017_v61, 0 }
 0x839   : > { %v3435_v59 = vpop.eup %3434  ;;  %3234 = vmatprep.subr.bf16.mxu0 %v3617_v16 }
 0x83a   : > { %v1645_v60 = vmul.f32 %v3435_v59, %v3427_v30 }
 0x83b   : > { %v2015_v4 = vpop.permute.xlu1 %2014 }
 0x83c   : > { %v1649_v62 = vpack.c.bf16 %v1645_v60, %v1645_v60 }
 0x83e   : > { %3207 = vmatmul.mubr.msk.bf16.vlgmr.msra.gmra.mxu1 %vm506_vm3, %v1649_v62 }
 0x83f   : > { %3217 = vmatpush3.bf16.xpose.msra.mxu1 %v1872_v0  ;;  %3225 = vmatmul.mubr.msk.bf16.vlgmr.msra.gmra.mxu0 %vm506_vm3, %v1915_v56 }
 0x840   : > { %3235 = vmatpush3.bf16.xpose.msra.mxu0 %v2022_v1  ;;  %3218 = vmatprep.mubr.msk.bf16.mxu1 %vm3618_vm2, %v3617_v16 }
 0x841   : > { %3228 = vmatprep.subr.bf16.mxu1 %v3617_v16  ;;  %3236 = vmatprep.mubr.msk.bf16.mxu0 %vm3618_vm2, %v3617_v16 }
 0x842   : > { %3246 = vmatprep.subr.bf16.mxu0 %v3617_v16 }
 0x846   : > { %3219 = vmatmul.mubr.msk.bf16.vlgmr.msra.gmra.mxu1 %vm506_vm3, %v1865_v63 }
 0x847   : > { %3229 = vmatpush3.bf16.xpose.msra.mxu1 %v1972_v3  ;;  %3237 = vmatmul.mubr.msk.bf16.vlgmr.msra.gmra.mxu0 %vm506_vm3, %v2015_v4 }
 0x848   : > { %3230 = vmatprep.mubr.msk.bf16.mxu1 %vm3618_vm2, %v3617_v16  ;;  %3240 = vmatprep.subr.bf16.mxu1 %v3617_v16 }
 0x849   : > { %3248 = vmatprep.mubr.msk.bf16.mxu0 %vm3618_vm2, %v3617_v16 }
 0x84e   : > { %3231 = vmatmul.mubr.msk.bf16.vlgmr.msra.gmra.mxu1 %vm506_vm3, %v1965_v5 }
 0x84f   : > { %3242 = vmatprep.mubr.msk.bf16.mxu1 %vm3618_vm2, %v3617_v16 }
 0x8c2   : > { %v4045_v6 = vpop.f32.mrf.mxu0 }
 0x8c4   : > { %v3202_v7 = vpop.f32.mrf.mxu0 }
 0x8c5   : > { %v4047_v8 = vpop.f32.mrf.mxu1 }
 0x8c6   : > { %v1744_v9 = vpop.f32.mrf.mxu0 }
 0x8c7   : > { %v3196_v10 = vpop.f32.mrf.mxu1 }
 0x8c8   : > { %v3203_v11 = vpop.f32.mrf.mxu0 }
 0x8c9   : > { %v1696_v12 = vpop.f32.mrf.mxu1 }
 0x8cb   : > { %v3197_v14 = vpop.f32.mrf.mxu1 }
 0x8f7   : > { %v4049_v15 = vpop.f32.mrf.mxu0 }
 0x8f9   : > { %v3214_v17 = vpop.f32.mrf.mxu0 }
 0x8fb   : > { %v1840_v18 = vpop.f32.mrf.mxu0 }
 0x8fd   : > { %v3215_v19 = vpop.f32.mrf.mxu0 }
 0x8fe   : > { %v4051_v20 = vpop.f32.mrf.mxu1 }
 0x8ff   : > { %v1958_v22 = vpop.f32.mrf.mxu0 }
 0x900   : > { %v3208_v23 = vpop.f32.mrf.mxu1  ;;  %v2067_v25 = vsel %vm506_vm3, %v1958_v22, -inf }
 0x901   : > { %2068 = vmax.xlane.f32.xlu1 %v2067_v25  ;;  %v3226_v26 = vpop.f32.mrf.mxu0 }
 0x902   : > { %v1792_v28 = vpop.f32.mrf.mxu1 }
 0x903   : > { %v1961_v30 = vpop.f32.mrf.mxu0 }
 0x904   : > { %v3209_v31 = vpop.f32.mrf.mxu1 }
 0x905   : > { %v3227_v34 = vpop.f32.mrf.mxu0 }
 0x906   : > { %v1908_v35 = vpop.f32.mrf.mxu1 }
 0x907   : > { %v2058_v36 = vpop.f32.mrf.mxu0  ;;  %v2064_v37 = vsel %vm506_vm3, %v1908_v35, -inf }
 0x908   : > { %2065 = vmax.xlane.f32.xlu0 %v2064_v37  ;;  %v3220_v38 = vpop.f32.mrf.mxu1  ;;  %v2073_v50 = vsel %vm506_vm3, %v2058_v36, -inf }
 0x909   : > { %v3238_v39 = vpop.f32.mrf.mxu0 }
 0x90a   : > { %v1911_v41 = vpop.f32.mrf.mxu1 }
 0x90b   : > { %v2061_v43 = vpop.f32.mrf.mxu0 }
 0x90c   : > { %v3221_v44 = vpop.f32.mrf.mxu1 }
 0x90d   : > { %v3239_v45 = vpop.f32.mrf.mxu0  ;;  %v3380_v44 = vld [vmem:[%s3785_s17 + $0x8] sm:$0xff]  }
 0x90e   : > { %v2008_v46 = vpop.f32.mrf.mxu1 }
 0x90f   : > { %v2070_v47 = vsel %vm506_vm3, %v2008_v46, -inf }
 0x910   : > { %2071 = vmax.xlane.f32.xlu0 %v2070_v47  ;;  %v3232_v48 = vpop.f32.mrf.mxu1 }
 0x912   : > { %2112 = vrot.lane.b32.xlu1 %v3819_v24, %s3629_s14  ;;  %v2011_v49 = vpop.f32.mrf.mxu1 }
 0x913   : > { %v3381_v49 = vld [vmem:[%s3785_s17] sm:$0xff]   ;;  %s4210_s17 = sadd.s32 4294967295, %s3611_s26  }
 0x914   : > { %2074 = vmax.xlane.f32.xlu0 %v2073_v50  ;;  %v3233_v51 = vpop.f32.mrf.mxu1  ;;  %p4161_p10 = scmp.eq.s32.totalorder %s4210_s17, 1 }
 0x98a   : > { %v2069_v52 = vpop.xlane.xlu1 %2068 }
 0x98b   : > { %v2077_v53 = vsub.f32 %v1958_v22, %v2069_v52 }
 0x98d   : > { %v2082_v54 = vmul.f32 1.442695, %v2077_v53 }
 0x98e   : > { %v2113_v55 = vpop.permute.xlu1 %2112 }
 0x98f   : > { %3436 = vpow2.f32 %v2082_v54  ;;  %v2118_v56 = vsel %vm750_vm4, %v2113_v55, 0 }
 0x990   : > { %3241 = vmatpush3.bf16.msra.mxu1 %v2118_v56 }
 0x991   : > { %v2066_v57 = vpop.xlane.xlu0 %2065  ;;  %3252 = vmatprep.subr.bf16.mxu1 %v3617_v16 }
 0x992   : > { %v2076_v58 = vsub.f32 %v1908_v35, %v2066_v57 }
 0x994   : > { %v2080_v59 = vmul.f32 1.442695, %v2076_v58 }
 0x996   : > { %3438 = vpow2.f32 %v2080_v59 }
 0x999   : > { %v2072_v24 = vpop.xlane.xlu0 %2071 }
 0x99a   : > { %v2078_v60 = vsub.f32 %v2008_v46, %v2072_v24 }
 0x99c   : > { %v3437_v61 = vpop.eup %3436  ;;  %v2084_v62 = vmul.f32 1.442695, %v2078_v60  ;;  %v2483_v60 = vsub.s32 3, %v3807_v13 }
 0x99d   : > { %v2091_v63 = vsel %vm506_vm3, %v3437_v61, 0.0  ;;  %v2075_v0 = vpop.xlane.xlu0 %2074 }
 0x99e   : > { %3440 = vpow2.f32 %v2084_v62  ;;  %2092 = vadd.xlane.f32.xlu0 %v2091_v63  ;;  %v2079_v1 = vsub.f32 %v2058_v36, %v2075_v0 }
 0x9a0   : > { %v2086_v2 = vmul.f32 1.442695, %v2079_v1 }
 0x9a2   : > { %3442 = vpow2.f32 %v2086_v2 }
 0x9a3   : > { %v3439_v3 = vpop.eup %3438 }
 0x9a4   : > { %v2088_v4 = vsel %vm506_vm3, %v3439_v3, 0.0 }
 0x9a5   : > { %2089 = vadd.xlane.f32.xlu1 %v2088_v4 }
 0x9ab   : > { %v3441_v5 = vpop.eup %3440 }
 0x9ac   : > { %v2094_v7 = vsel %vm506_vm3, %v3441_v5, 0.0 }
 0x9ad   : > { %2095 = vadd.xlane.f32.xlu1 %v2094_v7 }
 0x9af   : > { %v3443_v9 = vpop.eup %3442 }
 0x9b0   : > { %v2097_v10 = vsel %vm506_vm3, %v3443_v9, 0.0 }
 0x9b1   : > { %2098 = vadd.xlane.f32.xlu0 %v2097_v10 }
 0x9be   : > { %2208 = vrot.lane.b32.xlu1 %v3817_v21, %s3629_s14 }
 0x9c2   : > { %2256 = vrot.lane.b32.xlu1 %v3822_v27, %s3629_s14 }
 0x9c6   : > { %1388 = vrot.lane.b32.xlu1 %v3979_v33, %s3630_s27 }
 0x9c7   : > { %2160 = vrot.lane.b32.xlu0 %v3825_v29, %s3629_s14 }
 0x9ca   : > { %1392 = vrot.lane.b32.xlu1 %v3981_v40, %s3630_s27 }
 0x9cb   : > { %1386 = vrot.lane.b32.xlu0 %v3977_v32, %s3630_s27 }
 0x9ce   : > { %1849 = vrot.lane.b32.xlu1 %v4045_v6, %s3631_s13 }
 0x9cf   : > { %1390 = vrot.lane.b32.xlu0 %v3983_v42, %s3630_s27 }
 0x9d2   : > { %1853 = vrot.lane.b32.xlu1 %v4049_v15, %s3631_s13 }
 0x9d3   : > { %1847 = vrot.lane.b32.xlu0 %v4047_v8, %s3631_s13 }
 0x9d7   : > { %1851 = vrot.lane.b32.xlu0 %v4051_v20, %s3631_s13 }
 0xa27   : > { %v2093_v21 = vpop.xlane.xlu0 %2092 }
 0xa28   : > { %3444 = vrcp.f32 %v2093_v21 }
 0xa2e   : > { %v2090_v27 = vpop.xlane.xlu1 %2089 }
 0xa2f   : > { %3446 = vrcp.f32 %v2090_v27 }
 0xa35   : > { %v3445_v33 = vpop.eup %3444 }
 0xa36   : > { %v2096_v29 = vpop.xlane.xlu1 %2095  ;;  %v2105_v12 = vmul.f32 %v3445_v33, %v3437_v61  ;;  %v4105_v61 = vld [vmem:[%s3771_s18] sm:$0xff] }
 0xa37   : > { %3448 = vrcp.f32 %v2096_v29  ;;  %v2484_v62 = vrot.slane %v4105_v61, %v2483_v60 }
 0xa38   : > { %v2109_v18 = vpack.c.bf16 %v2105_v12, %v2105_v12 }
 0xa3a   : > { %v2209_v32 = vpop.permute.xlu1 %2208  ;;  %v2099_v40 = vpop.xlane.xlu0 %2098 }
 0xa3b   : > { %3450 = vrcp.f32 %v2099_v40  ;;  %v2214_v17 = vsel %vm750_vm4, %v2209_v32, 0  ;;  %v3469_v40 = vld [vmem:[#allocation8] sm:$0xff] }
 0xa3c   : > { %v3447_v6 = vpop.eup %3446 }
 0xa3d   : > { %v2104_v11 = vmul.f32 %v3447_v6, %v3439_v3 }
 0xa3e   : > { %v2257_v42 = vpop.permute.xlu1 %2256  ;;  %v2161_v14 = vpop.permute.xlu0 %2160 }
 0xa3f   : > { %v2166_v15 = vsel %vm750_vm4, %v2161_v14, 0  ;;  %v2108_v8 = vpack.c.bf16 %v2104_v11, %v2104_v11  ;;  %v2262_v22 = vsel %vm750_vm4, %v2257_v42, 0 }
 0xa40   : > { %3247 = vmatpush3.bf16.msra.mxu0 %v2166_v15  ;;  %v3470_v15 = vld [vmem:[#allocation8 + $0x10] sm:$0xff] }
 0xa41   : > { %3243 = vmatmul.mubr.msk.bf16.vlgmr.msra.gmra.mxu1 %vm506_vm3, %v2108_v8  ;;  %3258 = vmatprep.subr.bf16.mxu0 %v3617_v16 }
 0xa42   : > { %3253 = vmatpush3.bf16.msra.mxu1 %v2214_v17  ;;  %v1389_v19 = vpop.permute.xlu1 %1388  ;;  %v1387_v20 = vpop.permute.xlu0 %1386  ;;  %3254 = vmatprep.mubr.msk.bf16.mxu1 %vm3618_vm2, %v3617_v16  ;;  %v3471_v17 = vld [vmem:[#allocation8 + $0x8] sm:$0xff] }
 0xa43   : > { %1400 = vst.msk [vmem:[#allocation2 + $0x8] sm:$0xff] %vm1398_vm5, %v1389_v19  ;;  %1399 = vst.msk [vmem:[#allocation2] sm:$0xff] %vm1398_vm5, %v1387_v20  ;;  %3249 = vmatmul.mubr.msk.bf16.vlgmr.msra.gmra.mxu0 %vm506_vm3, %v2109_v18  ;;  %3264 = vmatprep.subr.bf16.mxu1 %v3380_v44 }
 0xa44   : > { %v3449_v23 = vpop.eup %3448  ;;  %3259 = vmatpush3.bf16.msra.mxu0 %v2262_v22  ;;  %3260 = vmatprep.mubr.msk.bf16.mxu0 %vm3618_vm2, %v3617_v16  ;;  %v3472_v22 = vld [vmem:[#allocation8 + $0x18] sm:$0xff] }
 0xa45   : > { %v2106_v25 = vmul.f32 %v3449_v23, %v3441_v5 }
 0xa46   : > { %v1393_v26 = vpop.permute.xlu1 %1392  ;;  %v1391_v28 = vpop.permute.xlu0 %1390 }
 0xa47   : > { %1402 = vst.msk [vmem:[#allocation2 + $0x18] sm:$0xff] %vm1398_vm5, %v1393_v26  ;;  %1401 = vst.msk [vmem:[#allocation2 + $0x10] sm:$0xff] %vm1398_vm5, %v1391_v28  ;;  %v2110_v30 = vpack.c.bf16 %v2106_v25, %v2106_v25 }
 0xa48   : > { %v3451_v31 = vpop.eup %3450 }
 0xa49   : > { %3255 = vmatmul.mubr.msk.bf16.vlgmr.msra.gmra.mxu1 %vm506_vm3, %v2110_v30  ;;  %v2107_v34 = vmul.f32 %v3451_v31, %v3443_v9  ;;  %v2337_v9 = vsub.s32 1, %v3807_v13 }
 0xa4a   : > { %v1850_v35 = vpop.permute.xlu1 %1849  ;;  %v1848_v36 = vpop.permute.xlu0 %1847  ;;  %3265 = vmatpush3.bf16.msra.mxu1 %v3380_v44 }
 0xa4b   : > { %1861 = vst.msk [vmem:[#allocation2 + $0x8] sm:$0xff] %vm1859_vm6, %v1850_v35  ;;  %1860 = vst.msk [vmem:[#allocation2] sm:$0xff] %vm1859_vm6, %v1848_v36  ;;  %v2111_v37 = vpack.c.bf16 %v2107_v34, %v2107_v34  ;;  %3266 = vmatprep.subr.bf16.mxu1 %v3381_v49  ;;  %v2338_v10 = vrot.slane %v4105_v61, %v2337_v9 }
 0xa4d   : > { %3261 = vmatmul.mubr.msk.bf16.vlgmr.msra.gmra.mxu0 %vm506_vm3, %v2111_v37 }
 0xa4e   : > { %v1854_v16 = vpop.permute.xlu1 %1853  ;;  %v1852_v38 = vpop.permute.xlu0 %1851  ;;  %3267 = vmatpush3.bf16.msra.mxu1 %v3381_v49 }
 0xa4f   : > { %1863 = vst.msk [vmem:[#allocation2 + $0x18] sm:$0xff] %vm1859_vm6, %v1854_v16  ;;  %1862 = vst.msk [vmem:[#allocation2 + $0x10] sm:$0xff] %vm1859_vm6, %v1852_v38 }
 0xb01   : > { %v2154_v39 = vpop.f32.mrf.mxu1 }
 0xb02   : > { %2308 = vrot.lane.b32.xlu0 %v2154_v39, %s3632_s16 }
 0xb03   : > { %v3244_v41 = vpop.f32.mrf.mxu1  ;;  %v2202_v43 = vpop.f32.mrf.mxu0 }
 0xb04   : > { %2310 = vrot.lane.b32.xlu1 %v2202_v43, %s3632_s16 }
 0xb05   : > { %v2157_v45 = vpop.f32.mrf.mxu1  ;;  %v3250_v46 = vpop.f32.mrf.mxu0 }
 0xb07   : > { %v3245_v47 = vpop.f32.mrf.mxu1  ;;  %v2205_v48 = vpop.f32.mrf.mxu0 }
 0xb09   : > { %v3251_v50 = vpop.f32.mrf.mxu0  ;;  %v2250_v51 = vpop.f32.mrf.mxu1 }
 0xb0a   : > { %2312 = vrot.lane.b32.xlu0 %v2250_v51, %s3632_s16  ;;  %v3382_v51 = vld [vmem:[%s3765_s12 + $0x8] sm:$0xff]  }
 0xb0b   : > { %v3256_v52 = vpop.f32.mrf.mxu1  ;;  %3272 = vmatprep.subr.bf16.mxu0 %v3382_v51 }
 0xb0c   : > { %v3383_v52 = vld [vmem:[%s3765_s12] sm:$0xff]   ;;  %3273 = vmatpush3.bf16.msra.mxu0 %v3382_v51  ;;  %s3633_s12 = smov [#allocation8]  }
 0xb0d   : > { %v2253_v53 = vpop.f32.mrf.mxu1  ;;  %v2298_v54 = vpop.f32.mrf.mxu0  ;;  %3274 = vmatprep.subr.bf16.mxu0 %v3383_v52  ;;  %s2759_s18 = sshll.u32 %s3633_s12, 4  ;;  %s2760_s18 = int_to_ptr.vmem [resolvable:$true] %s2759_s18 }
 0xb0e   : > { %2314 = vrot.lane.b32.xlu1 %v2298_v54, %s3632_s16  ;;  %v3384_v53 = vld [vmem:[%s3790_s8 + $0x18] sm:$0xff]   ;;  %s3529_s20 = scalar_lea.vmem %s2760_s18, 512  ;;  %p3536_p6 = scmp.lt.s32.totalorder %s2760_s18, %s2760_s18 }
 0xb0f   : > { %v3257_v55 = vpop.f32.mrf.mxu1  ;;  %v3262_v56 = vpop.f32.mrf.mxu0  ;;  %3280 = vmatprep.subr.bf16.mxu1 %v3384_v53  ;;  %p3530_p3 = scmp.ne.s32.totalorder %s2760_s18, %s3529_s20  ;;  %p3537_p8 = scmp.lt.s32.totalorder %s3529_s20, %s3529_s20 }
 0xb10   : > { %3275 = vmatpush3.bf16.msra.mxu0 %v3383_v52 }
 0xb11   : > { %v2301_v57 = vpop.f32.mrf.mxu0  ;;  %p3531_p4 = pnand %p3530_p3, %p4161_p10  ;;  %p3538_p11 = por %p3537_p8, %p3536_p6 }
 0xb13   : > { %v3263_v58 = vpop.f32.mrf.mxu0  ;;  %p3532_p5 = pneg %p3531_p4 }
 0xb15   : > { %p3539_p12 = pnand %p3538_p11, %p3532_p5 }
 0xb74   : > { %v2309_v59 = vpop.permute.xlu0 %2308 }
 0xb75   : > { %2321 = vst.msk [vmem:[#allocation2] sm:$0xff] %vm2320_vm7, %v2309_v59 }
 0xb76   : > { %v2311_v24 = vpop.permute.xlu1 %2310 }
 0xb77   : > { %2322 = vst.msk [vmem:[#allocation2 + $0x8] sm:$0xff] %vm2320_vm7, %v2311_v24 }
 0xb7c   : > { %v2325_v63 = vld [vmem:[#allocation2] sm:$0xff]  ;;  %v2313_v0 = vpop.permute.xlu0 %2312 }
 0xb7d   : > { %2485 = vst.msk [vmem:[#allocation2] sm:$0xff] %vm436_vm1, %v2484_v62 }
 0xb7e   : > { %2323 = vst.msk [vmem:[#allocation2 + $0x10] sm:$0xff] %vm2320_vm7, %v2313_v0  ;;  %v2326_v1 = vld [vmem:[#allocation2 + $0x8] sm:$0xff] }
 0xb7f   : > { %2486 = vst.msk [vmem:[#allocation2 + $0x8] sm:$0xff] %vm436_vm1, %v2484_v62  ;;  %v2329_v2 = vpack.c.bf16 %v2326_v1, %v2325_v63 }
 0xb80   : > { %v2315_v3 = vpop.permute.xlu1 %2314 }
 0xb81   : > { %2324 = vst.msk [vmem:[#allocation2 + $0x18] sm:$0xff] %vm2320_vm7, %v2315_v3  ;;  %3268 = vmatprep.mubr.msk.bf16.mxu1 %vm436_vm1, %v2329_v2  ;;  %v2465_v2 = vsub.s32 4, %v3807_v13 }
 0xb85   : > { %v2327_v4 = vld [vmem:[#allocation2 + $0x10] sm:$0xff] }
 0xb86   : > { %2487 = vst.msk [vmem:[#allocation2 + $0x10] sm:$0xff] %vm436_vm1, %v2484_v62 }
 0xb88   : > { %v2328_v5 = vld [vmem:[#allocation2 + $0x18] sm:$0xff] }
 0xb89   : > { %v2330_v7 = vpack.c.bf16 %v2328_v5, %v2327_v4  ;;  %2488 = vst.msk [vmem:[#allocation2 + $0x18] sm:$0xff] %vm436_vm1, %v2484_v62  ;;  %v2466_v5 = vrot.slane %v4105_v61, %v2465_v2 }
 0xb8b   : > { %3269 = vmatmul.mubr.msk.bf16.vlgmr.msra.gmra.mxu1 %vm436_vm1, %v2330_v7  ;;  %v2473_v7 = vsub.s32 5, %v3807_v13 }
 0xb8c   : > { %3281 = vmatpush3.bf16.msra.mxu1 %v3384_v53  ;;  %v2569_v53 = vld [vmem:[#allocation2 + $0x8] sm:$0xff] }
 0xc4b   : > { %v3270_v21 = vpop.f32.mrf.mxu1 }
 0xc4c   : > { %v2400_v29 = vadd.f32 %v3270_v21, %v2338_v10 }
 0xc4d   : > { %v2391_v27 = vpop.f32.mrf.mxu1 }
 0xc4e   : > { %v2392_v33 = vadd.f32 %v2391_v27, %v2338_v10  ;;  %v2408_v8 = vadd.f32 %v3470_v15, %v2400_v29 }
 0xc4f   : > { %v3271_v32 = vpop.f32.mrf.mxu1 }
 0xc50   : > { %v2406_v6 = vadd.f32 %v3469_v40, %v2392_v33  ;;  %v2403_v12 = vadd.f32 %v3271_v32, %v2338_v10  ;;  %v2416_v20 = vsel %vm436_vm1, %v2408_v8, 0.0  ;;  %v2474_v33 = vrot.slane %v4105_v61, %v2473_v7 }
 0xc51   : > { %v2394_v11 = vpop.f32.mrf.mxu1 }
 0xc52   : > { %v2395_v42 = vadd.f32 %v2394_v11, %v2338_v10  ;;  %v2410_v14 = vsel %vm436_vm1, %v2406_v6, 0.0  ;;  %v2409_v23 = vadd.f32 %v3472_v22, %v2403_v12  ;;  %v3387_v22 = vld [vmem:[%s3790_s8] sm:$0xff]  }
 0xc53   : > { %2411 = vadd.xlane.f32.xlu0 %v2410_v14 }
 0xc54   : > { %v2407_v18 = vadd.f32 %v3471_v17, %v2395_v42  ;;  %v2419_v25 = vsel %vm436_vm1, %v2409_v23, 0.0 }
 0xc56   : > { %v2413_v19 = vsel %vm436_vm1, %v2407_v18, 0.0 }
 0xc57   : > { %2414 = vadd.xlane.f32.xlu1 %v2413_v19  ;;  %2417 = vadd.xlane.f32.xlu0 %v2416_v20  ;;  %v3385_v19 = vld [vmem:[%s3790_s8 + $0x10] sm:$0xff]   ;;  %v3386_v20 = vld [vmem:[%s3790_s8 + $0x8] sm:$0xff]  }
 0xc58   : > { %3282 = vmatprep.subr.bf16.mxu1 %v3385_v19 }
 0xc59   : > { %3283 = vmatpush3.bf16.msra.mxu1 %v3385_v19 }
 0xc5a   : > { %3284 = vmatprep.subr.bf16.mxu1 %v3386_v20 }
 0xc5b   : > { %2420 = vadd.xlane.f32.xlu0 %v2419_v25 }
 0xc5d   : > { %3285 = vmatpush3.bf16.msra.mxu1 %v3386_v20 }
 0xc5e   : > { %3286 = vmatprep.subr.bf16.mxu1 %v3387_v22 }
 0xc61   : > { %3287 = vmatpush3.bf16.msra.mxu1 %v3387_v22 }
 0xcdc   : > { %v2412_v26 = vpop.xlane.xlu0 %2411 }
 0xcdd   : > { %v2423_v28 = vmul.f32 0.03125, %v2412_v26 }
 0xcdf   : > { %v2427_v30 = vsub.f32 %v2406_v6, %v2423_v28 }
 0xce0   : > { %v2415_v31 = vpop.xlane.xlu1 %2414  ;;  %v2418_v34 = vpop.xlane.xlu0 %2417 }
 0xce1   : > { %v2424_v35 = vmul.f32 0.03125, %v2415_v31  ;;  %v2425_v36 = vmul.f32 0.03125, %v2418_v34  ;;  %v2431_v37 = vmul.f32 %v2427_v30, %v2427_v30 }
 0xce3   : > { %v2428_v16 = vsub.f32 %v2407_v18, %v2424_v35  ;;  %v2429_v38 = vsub.f32 %v2408_v8, %v2425_v36  ;;  %v2435_v39 = vsel %vm436_vm1, %v2431_v37, 0.0 }
 0xce4   : > { %2436 = vadd.xlane.f32.xlu1 %v2435_v39  ;;  %v2421_v41 = vpop.xlane.xlu0 %2420 }
 0xce5   : > { %v2426_v43 = vmul.f32 0.03125, %v2421_v41  ;;  %v2432_v44 = vmul.f32 %v2428_v16, %v2428_v16  ;;  %v2433_v45 = vmul.f32 %v2429_v38, %v2429_v38 }
 0xce7   : > { %v2430_v46 = vsub.f32 %v2409_v23, %v2426_v43  ;;  %v2438_v47 = vsel %vm436_vm1, %v2432_v44, 0.0  ;;  %v2441_v48 = vsel %vm436_vm1, %v2433_v45, 0.0  ;;  %v2495_v23 = vsub.s32 2, %v3807_v13  ;;  %v2570_v45 = vld [vmem:[#allocation2 + $0x10] sm:$0xff] }
 0xce8   : > { %2439 = vadd.xlane.f32.xlu0 %v2438_v47  ;;  %2442 = vadd.xlane.f32.xlu1 %v2441_v48  ;;  %v2568_v47 = vld [vmem:[#allocation2] sm:$0xff] }
 0xce9   : > { %v2434_v49 = vmul.f32 %v2430_v46, %v2430_v46  ;;  %v2496_v26 = vrot.slane %v4105_v61, %v2495_v23 }
 0xceb   : > { %v2444_v50 = vsel %vm436_vm1, %v2434_v49, 0.0 }
 0xcec   : > { %2445 = vadd.xlane.f32.xlu0 %v2444_v50  ;;  %v2571_v50 = vld [vmem:[#allocation2 + $0x18] sm:$0xff] }
 0xd6d   : > { %v2437_v54 = vpop.xlane.xlu1 %2436 }
 0xd6e   : > { %v2447_v55 = vmul.f32 0.03125, %v2437_v54 }
 0xd70   : > { %v2451_v56 = vadd.f32 1e-05, %v2447_v55 }
 0xd71   : > { %v2443_v57 = vpop.xlane.xlu1 %2442  ;;  %v2440_v58 = vpop.xlane.xlu0 %2439 }
 0xd72   : > { %3452 = vrsqrt.f32 %v2451_v56  ;;  %v2449_v59 = vmul.f32 0.03125, %v2443_v57  ;;  %v2448_v24 = vmul.f32 0.03125, %v2440_v58 }
 0xd74   : > { %v2453_v60 = vadd.f32 1e-05, %v2449_v59  ;;  %v2452_v62 = vadd.f32 1e-05, %v2448_v24 }
 0xd75   : > { %v2446_v63 = vpop.xlane.xlu0 %2445 }
 0xd76   : > { %3454 = vrsqrt.f32 %v2453_v60  ;;  %v2450_v0 = vmul.f32 0.03125, %v2446_v63 }
 0xd77   : > { %3456 = vrsqrt.f32 %v2452_v62 }
 0xd78   : > { %v2454_v1 = vadd.f32 1e-05, %v2450_v0 }
 0xd7a   : > { %3458 = vrsqrt.f32 %v2454_v1 }
 0xd7f   : > { %v3453_v3 = vpop.eup %3452 }
 0xd80   : > { %v2459_v4 = vmul.f32 %v3453_v3, %v2427_v30 }
 0xd82   : > { %v2467_v29 = vmul.f32 %v2466_v5, %v2459_v4 }
 0xd83   : > { %v3455_v9 = vpop.eup %3454 }
 0xd84   : > { %v3457_v10 = vpop.eup %3456  ;;  %v2461_v21 = vmul.f32 %v3455_v9, %v2429_v38  ;;  %v2475_v12 = vadd.f32 %v2474_v33, %v2467_v29 }
 0xd85   : > { %v2460_v27 = vmul.f32 %v3457_v10, %v2428_v16 }
 0xd86   : > { %v2469_v11 = vmul.f32 %v2466_v5, %v2461_v21 }
 0xd87   : > { %v3459_v32 = vpop.eup %3458  ;;  %v2468_v40 = vmul.f32 %v2466_v5, %v2460_v27 }
 0xd88   : > { %v2462_v6 = vmul.f32 %v3459_v32, %v2430_v46  ;;  %v2477_v8 = vadd.f32 %v2474_v33, %v2469_v11 }
 0xd89   : > { %v2476_v42 = vadd.f32 %v2474_v33, %v2468_v40 }
 0xd8a   : > { %v2470_v14 = vmul.f32 %v2466_v5, %v2462_v6 }
 0xd8b   : > { %v2479_v15 = vpack.c.bf16 %v2476_v42, %v2475_v12 }
 0xd8c   : > { %v2478_v17 = vadd.f32 %v2474_v33, %v2470_v14 }
 0xd8d   : > { %3276 = vmatprep.mubr.msk.bf16.mxu0 %vm436_vm1, %v2479_v15 }
 0xd8e   : > { %v2480_v18 = vpack.c.bf16 %v2478_v17, %v2477_v8 }
 0xd90   : > { %3277 = vmatmul.mubr.msk.bf16.vlgmr.msra.gmra.mxu0 %vm436_vm1, %v2480_v18 }
 0xe50   : > { %v3278_v25 = vpop.f32.mrf.mxu0 }
 0xe51   : > { %v2558_v35 = vadd.f32 %v3278_v25, %v2496_v26 }
 0xe52   : > { %v2549_v28 = vpop.f32.mrf.mxu0 }
 0xe53   : > { %v2550_v31 = vadd.f32 %v2549_v28, %v2496_v26  ;;  %v2566_v41 = vmax.f32 %v2558_v35, 0.0 }
 0xe54   : > { %v3279_v30 = vpop.f32.mrf.mxu0 }
 0xe55   : > { %v2561_v34 = vadd.f32 %v3279_v30, %v2496_v26  ;;  %v2564_v38 = vmax.f32 %v2550_v31, 0.0 }
 0xe56   : > { %v2552_v36 = vpop.f32.mrf.mxu0 }
 0xe57   : > { %v2553_v37 = vadd.f32 %v2552_v36, %v2496_v26  ;;  %v2567_v16 = vmax.f32 %v2561_v34, 0.0 }
 0xe59   : > { %v2565_v39 = vmax.f32 %v2553_v37, 0.0  ;;  %v2573_v44 = vpack.c.bf16 %v2567_v16, %v2566_v41  ;;  %v2732_v16 = vsub.s32 6, %v3807_v13 }
 0xe5b   : > { %v2572_v43 = vpack.c.bf16 %v2565_v39, %v2564_v38  ;;  %v2740_v38 = vsub.s32 7, %v3807_v13  ;;  %v2733_v39 = vrot.slane %v4105_v61, %v2732_v16 }
 0xe5d   : > { %3288 = vmatprep.mubr.msk.bf16.mxu1 %vm2606_vm8, %v2572_v43  ;;  %v2741_v43 = vrot.slane %v4105_v61, %v2740_v38 }
 0xe5e   : > { %3289 = vmatmul.mubr.msk.bf16.vlgmr.msra.gmra.mxu1 %vm2606_vm8, %v2573_v44 }
 0xf1e   : > { %v3290_v46 = vpop.f32.mrf.mxu1 }
 0xf1f   : > { %v2664_v48 = vadd.f32 %v3290_v46, %v2570_v45 }
 0xf20   : > { %v2647_v49 = vpop.f32.mrf.mxu1 }
 0xf21   : > { %2668 = vst.msk [vmem:[#allocation2 + $0x10] sm:$0xff] %vm436_vm1, %v2664_v48  ;;  %v2662_v51 = vadd.f32 %v2647_v49, %v2568_v47 }
 0xf22   : > { %v3291_v52 = vpop.f32.mrf.mxu1 }
 0xf23   : > { %2666 = vst.msk [vmem:[#allocation2] sm:$0xff] %vm436_vm1, %v2662_v51  ;;  %v2665_v54 = vadd.f32 %v3291_v52, %v2571_v50 }
 0xf24   : > { %v2650_v55 = vpop.f32.mrf.mxu1 }
 0xf25   : > { %2669 = vst.msk [vmem:[#allocation2 + $0x18] sm:$0xff] %vm436_vm1, %v2665_v54  ;;  %v2663_v56 = vadd.f32 %v2650_v55, %v2569_v53 }
 0xf27   : > { %2667 = vst.msk [vmem:[#allocation2 + $0x8] sm:$0xff] %vm436_vm1, %v2663_v56 }
 0xf28   : > { %v2672_v58 = vld [vmem:[#allocation2 + $0x10] sm:$0xff] }
 0xf29   : > { %v2676_v60 = vadd.f32 %v2672_v58, %v2477_v8 }
 0xf2a   : > { %v2670_v57 = vld [vmem:[#allocation2] sm:$0xff] }
 0xf2b   : > { %v2674_v59 = vadd.f32 %v2670_v57, %v2475_v12  ;;  %v2684_v1 = vsel %vm436_vm1, %v2676_v60, 0.0 }
 0xf2c   : > { %v2673_v63 = vld [vmem:[#allocation2 + $0x18] sm:$0xff] }
 0xf2d   : > { %v2678_v24 = vsel %vm436_vm1, %v2674_v59, 0.0  ;;  %v2677_v3 = vadd.f32 %v2673_v63, %v2478_v17 }
 0xf2e   : > { %2679 = vadd.xlane.f32.xlu1 %v2678_v24  ;;  %v2671_v62 = vld [vmem:[#allocation2 + $0x8] sm:$0xff] }
 0xf2f   : > { %v2675_v0 = vadd.f32 %v2671_v62, %v2476_v42  ;;  %v2687_v4 = vsel %vm436_vm1, %v2677_v3, 0.0 }
 0xf31   : > { %v2681_v2 = vsel %vm436_vm1, %v2675_v0, 0.0 }
 0xf32   : > { %2685 = vadd.xlane.f32.xlu1 %v2684_v1  ;;  %2682 = vadd.xlane.f32.xlu0 %v2681_v2 }
 0xf36   : > { %2688 = vadd.xlane.f32.xlu0 %v2687_v4 }
 0xfb7   : > { %v2680_v5 = vpop.xlane.xlu1 %2679 }
 0xfb8   : > { %v2690_v7 = vmul.f32 0.03125, %v2680_v5 }
 0xfba   : > { %v2694_v9 = vsub.f32 %v2674_v59, %v2690_v7 }
 0xfbb   : > { %v2686_v10 = vpop.xlane.xlu1 %2685  ;;  %v2683_v21 = vpop.xlane.xlu0 %2682 }
 0xfbc   : > { %v2692_v27 = vmul.f32 0.03125, %v2686_v10  ;;  %v2691_v29 = vmul.f32 0.03125, %v2683_v21  ;;  %v2698_v33 = vmul.f32 %v2694_v9, %v2694_v9 }
 0xfbe   : > { %v2696_v32 = vsub.f32 %v2676_v60, %v2692_v27  ;;  %v2695_v40 = vsub.f32 %v2675_v0, %v2691_v29  ;;  %v2702_v6 = vsel %vm436_vm1, %v2698_v33, 0.0 }
 0xfbf   : > { %2703 = vadd.xlane.f32.xlu1 %v2702_v6  ;;  %v2689_v11 = vpop.xlane.xlu0 %2688 }
 0xfc0   : > { %v2693_v12 = vmul.f32 0.03125, %v2689_v11  ;;  %v2700_v42 = vmul.f32 %v2696_v32, %v2696_v32  ;;  %v2699_v14 = vmul.f32 %v2695_v40, %v2695_v40 }
 0xfc2   : > { %v2697_v15 = vsub.f32 %v2677_v3, %v2693_v12  ;;  %v2708_v8 = vsel %vm436_vm1, %v2700_v42, 0.0  ;;  %v2705_v17 = vsel %vm436_vm1, %v2699_v14, 0.0 }
 0xfc3   : > { %2709 = vadd.xlane.f32.xlu1 %v2708_v8  ;;  %2706 = vadd.xlane.f32.xlu0 %v2705_v17 }
 0xfc4   : > { %v2701_v18 = vmul.f32 %v2697_v15, %v2697_v15 }
 0xfc6   : > { %v2711_v19 = vsel %vm436_vm1, %v2701_v18, 0.0 }
 0xfc7   : > { %2712 = vadd.xlane.f32.xlu0 %v2711_v19 }
0x1048   : > { %v2704_v20 = vpop.xlane.xlu1 %2703 }
0x1049   : > { %v2714_v22 = vmul.f32 0.03125, %v2704_v20 }
0x104b   : > { %v2718_v23 = vadd.f32 1e-05, %v2714_v22 }
0x104c   : > { %v2710_v25 = vpop.xlane.xlu1 %2709  ;;  %v2707_v26 = vpop.xlane.xlu0 %2706 }
0x104d   : > { %3460 = vrsqrt.f32 %v2718_v23  ;;  %v2716_v28 = vmul.f32 0.03125, %v2710_v25  ;;  %v2715_v30 = vmul.f32 0.03125, %v2707_v26 }
0x104f   : > { %v2720_v31 = vadd.f32 1e-05, %v2716_v28  ;;  %v2719_v34 = vadd.f32 1e-05, %v2715_v30 }
0x1050   : > { %v2713_v35 = vpop.xlane.xlu0 %2712 }
0x1051   : > { %3462 = vrsqrt.f32 %v2720_v31  ;;  %v2717_v36 = vmul.f32 0.03125, %v2713_v35 }
0x1052   : > { %3464 = vrsqrt.f32 %v2719_v34 }
0x1053   : > { %v2721_v37 = vadd.f32 1e-05, %v2717_v36 }
0x1055   : > { %3466 = vrsqrt.f32 %v2721_v37 }
0x105a   : > { %v3461_v41 = vpop.eup %3460 }
0x105b   : > { %v2726_v44 = vmul.f32 %v3461_v41, %v2694_v9 }
0x105d   : > { %v2734_v45 = vmul.f32 %v2733_v39, %v2726_v44 }
0x105e   : > { %v3463_v46 = vpop.eup %3462 }
0x105f   : > { %v3465_v47 = vpop.eup %3464  ;;  %v2742_v48 = vadd.f32 %v2741_v43, %v2734_v45  ;;  %v2728_v49 = vmul.f32 %v3463_v46, %v2696_v32 }
0x1060   : > { %v2727_v50 = vmul.f32 %v3465_v47, %v2695_v40 }
0x1061   : > { %2746 = vst.msk [vmem:[#allocation8] sm:$0xff] %vm436_vm1, %v2742_v48  ;;  %v2736_v51 = vmul.f32 %v2733_v39, %v2728_v49 }
0x1062   : > { %v3467_v52 = vpop.eup %3466  ;;  %v2735_v53 = vmul.f32 %v2733_v39, %v2727_v50 }
0x1063   : > { %v2744_v54 = vadd.f32 %v2741_v43, %v2736_v51  ;;  %v2729_v13 = vmul.f32 %v3467_v52, %v2697_v15 }
0x1064   : > { %v2743_v55 = vadd.f32 %v2741_v43, %v2735_v53 }
0x1065   : > { %2748 = vst.msk [vmem:[#allocation8 + $0x10] sm:$0xff] %vm436_vm1, %v2744_v54  ;;  %v2737_v61 = vmul.f32 %v2733_v39, %v2729_v13 }
0x1066   : > { %2747 = vst.msk [vmem:[#allocation8 + $0x8] sm:$0xff] %vm436_vm1, %v2743_v55 }
0x1067   : > { %v2745_v56 = vadd.f32 %v2741_v43, %v2737_v61 }
0x1069   : > { %2749 = vst.msk [vmem:[#allocation8 + $0x18] sm:$0xff] %vm436_vm1, %v2745_v56 }
0x106a   : > { %3542 = shalt.err (!%p3539_p12)
}
0x106b   : > { %s3634_s24 = smov 128  }
0x106c   : > { %3297 = dma.vmem_to_hbm [thread:$0]  (%p4161_p10), %s2760_s18, 512, %s4202_s6, [#allocation5], %s3634_s24, %s3634_s24, %s3630_s27  }
0x106d   : > { %3586 = dma.done.wait (%p4161_p10), [#allocation5], 512  }
0x106e   : > { %3588 = vsyncadd (%p4161_p10), [#allocation5], 4294966784 }
0x106f PF: > { %s23_s26 = sadd.s32 1, %s3611_s26   ;;  %s4212_s21 = smov %s3595_s22 }
0x1070   : > { %p20_p13 = scmp.ge.s32.totalorder %s23_s26, 4   ;;  %s4213_s22 = smov %s3599_s23 }
0x1071   : > { %s4214_s23 = smov %s3721_s9  ;;  %s4215_s24 = smov %s3607_s25 }
0x1072   : > { %s4216_s25 = smov %s4218_s28  ;;  %22 = sbr.rel (!%p20_p13) target bundleno = 9 (0x9), region = 111 }
0x1077   :  { %2775 = vsyncpa [#allocation4], 1 }
0x1078   :  { %2777 = vsyncpa [#allocation4 + $0x1], 1 }
0x1079   :  { %2778 = vsyncpa [#allocation7], 1 }
0x107a   :  { %2780 = vsyncpa [#allocation7 + $0x1], 1 }
0x107b   :  { %2781 = vsyncpa [#allocation5], 1 }
0x107c   :  { %2783 = vsyncpa [#allocation5 + $0x1], 1 }

</bundles_post_ra>
